<compile_context>
chip_gen: v6e
topology: v6e:2x2x1
jax: 0.10.0
libtpu: 0.0.40
codegen_flags: <defaults>
</compile_context>

<pallas_src>
import jax
import jax.numpy as jnp
from jax.experimental import pallas as pl
from jax.experimental.pallas import tpu as pltpu


def _make_fused_kernel(W, KH, KW, n_body, rows, cin_pad, n_chan, neg_slope=0.2):
    """Per-batch fused forward (head + body + tail), lane-major activations.

    rows[l]  = number of flattened-frame entries layer l provides so that every
               downstream read stays inside computed data
               (rows[l+1] = rows[l] - ((KH-1)*W + (KW-1)));  rows[-1] == Ho*W.
    cin_pad  = head input channels zero-padded to a multiple of 16 (bf16 tile).
    n_chan   = hidden width N (multiple of 16).
    Entries whose w-coordinate falls outside the shrinking valid width are wrap-around
    garbage that valid entries never read; the wrapper crops the valid (Ho, Wo) patch.
    """
    tap_shifts = tuple(kh * W + kw for kh in range(KH) for kw in range(KW))
    n_taps = KH * KW

    def kernel(x_ref, wh_ref, bh_ref, wb_ref, bb_ref, wt_ref, bt_ref, o_ref,
               rhs_scr, *acts):

        def build_rhs(src, c, n_out):
            # Pack the 9 lane-shifted tap slices of `src` (c, n_in) along the K
            # (sublane) axis of the shared scratch -> (9*c, n_out) matmul RHS.
            # c is a multiple of 16, so every store is sublane-tile aligned; the
            # shifts themselves are cheap lane rotations (XLU slot).
            for t, s in enumerate(tap_shifts):
                rhs_scr[t * c:(t + 1) * c, :n_out] = src[:, s:s + n_out]
            return rhs_scr[:n_taps * c, :n_out]

        def lrelu(y):                       # LeakyReLU(0.2), f32 on the VPU
            return jnp.maximum(y, neg_slope * y)

        # head: ONE (N, 9*cin_pad) @ (9*cin_pad, rows[1]) bf16 matmul, f32 accumulate.
        rhs = build_rhs(x_ref[...], cin_pad, rows[1])
        y = jnp.dot(wh_ref[...], rhs, preferred_element_type=jnp.float32)
        acts[0][...] = lrelu(y + bh_ref[...]).astype(acts[0].dtype)

        # body: ONE (N, 9*N) @ (9*N, rows[l+2]) matmul per ConvBlock (K = 288).
        for li in range(n_body):
            rhs = build_rhs(acts[li][...], n_chan, rows[li + 2])
            y = jnp.dot(wb_ref[li], rhs, preferred_element_type=jnp.float32)
            acts[li + 1][...] = lrelu(y + bb_ref[li]).astype(acts[li + 1].dtype)

        # tail Conv2d(N -> 1): VPU multiply + sublane (tap*channel) reduce; the
        # (1, Ho*W) result is a single lane-dense store.
        rhs = build_rhs(acts[n_body][...], n_chan, rows[n_body + 2]).astype(jnp.float32)
        o_ref[...] = jnp.sum(rhs * wt_ref[...], axis=0, keepdims=True) + bt_ref[0]

    return kernel


@jax.jit
def level_wdiscriminator(x_nchw, params):
    """Forward pass: x (B, C, H, W) NCHW -> (B, 1, Ho, Wo) NCHW (stride-1 VALID convs)."""
    wh, bh, wb, bb, wt, bt = params
    B, Cin, H, W = x_nchw.shape
    N, _, KH, KW = wh.shape
    n_body = wb.shape[0]
    n_convs = n_body + 2                                  # head + body + tail
    Ho, Wo = H - n_convs * (KH - 1), W - n_convs * (KW - 1)
    # Guards for the wrap-around "garbage entry" scheme (stride-1 VALID convs only).
    assert W >= KW and Ho >= 1 and Wo >= 1
    assert N % 16 == 0                                    # keeps tap packing tile-aligned
    smax = (KH - 1) * W + (KW - 1)                        # largest tap shift
    pad = n_convs * (KW - 1)                              # makes rows[-1] == Ho*W exactly
    F_pad = H * W + pad
    rows = [F_pad]
    for _ in range(n_convs):
        rows.append(rows[-1] - smax)
    assert rows[-1] == Ho * W

    cin_pad = -(-Cin // 16) * 16                          # bf16 sublane-tile alignment

    # NCHW is already channel-major: flatten spatial onto lanes, zero-pad channels
    # (head alignment) and the frame tail (read only by entries the crop discards).
    xt = x_nchw.reshape(B, Cin, H * W)
    xt = jnp.pad(xt, ((0, 0), (0, cin_pad - Cin), (0, pad))).astype(jnp.bfloat16)

    # Fold the 9 taps into the K dimension of each weight (tap-major, channel-minor),
    # matching the RHS packing order in the kernel.
    wh_p = jnp.pad(wh, ((0, 0), (0, cin_pad - Cin), (0, 0), (0, 0)))
    wh_big = jnp.transpose(wh_p, (0, 2, 3, 1)).reshape(N, KH * KW * cin_pad).astype(jnp.bfloat16)
    wb_big = jnp.transpose(wb, (0, 1, 3, 4, 2)).reshape(n_body, N, KH * KW * N).astype(jnp.bfloat16)
    wt_col = jnp.transpose(wt, (2, 3, 1, 0)).reshape(KH * KW * N, 1)      # f32 (tail, VPU)
    bh_c = bh.reshape(N, 1)
    bb_c = bb.reshape(n_body, N, 1)

    kernel = _make_fused_kernel(W, KH, KW, n_body, tuple(rows), cin_pad, N)

    out = pl.pallas_call(
        kernel,
        out_shape=jax.ShapeDtypeStruct((B, 1, Ho * W), jnp.float32),
        grid=(B,),
        in_specs=[
            pl.BlockSpec((None, cin_pad, F_pad), lambda b: (b, 0, 0)),        # x (per batch)
            # Weights / biases: constant index maps -> no per-step re-fetch.
            pl.BlockSpec((N, KH * KW * cin_pad), lambda b: (0, 0)),           # head W (BN folded)
            pl.BlockSpec((N, 1), lambda b: (0, 0)),                           # head bias
            pl.BlockSpec((n_body, N, KH * KW * N), lambda b: (0, 0, 0)),      # body W (BN folded)
            pl.BlockSpec((n_body, N, 1), lambda b: (0, 0, 0)),                # body bias
            pl.BlockSpec((KH * KW * N, 1), lambda b: (0, 0)),                 # tail W column
            pl.BlockSpec(memory_space=pltpu.MemorySpace.SMEM),                # tail bias scalar
        ],
        out_specs=pl.BlockSpec((None, 1, Ho * W), lambda b: (b, 0, 0)),       # lane-dense out
        scratch_shapes=(
            [pltpu.VMEM((KH * KW * max(N, cin_pad), rows[1]), jnp.bfloat16)]  # shared tap-packed RHS
            + [pltpu.VMEM((N, rows[l + 1]), jnp.bfloat16)                     # VMEM-resident acts
               for l in range(n_body + 1)]),
        compiler_params=pltpu.CompilerParams(
            dimension_semantics=("parallel",),            # v7x: one batch per TensorCore
            vmem_limit_bytes=32 * 1024 * 1024),
    )(xt, wh_big, bh_c, wb_big, bb_c, wt_col, bt)

    # (B, 1, Ho*W) -> crop the valid columns of the W-wide frame -> (B, 1, Ho, Wo) NCHW.
    return out.reshape(B, 1, Ho, W)[:, :, :, :Wo]


def init_params(key, nc_current=4, nfc=32, ker=3, num_layer=3, eps=1e-5):
    """Deterministic synthetic parameters with BatchNorm folded (eval mode), OIHW layout.

    ConvBlock fold: scale = gamma / sqrt(var + eps);  W_fold = scale * W (per out-channel);
                    b_fold = beta + (conv_bias - mean) * scale.
    """
    def conv_block(k, cin, cout):
        ks = jax.random.split(k, 6)
        w = 0.1 * jax.random.normal(ks[0], (cout, cin, ker, ker), jnp.float32)   # OIHW
        b = 0.1 * jax.random.normal(ks[1], (cout,), jnp.float32)
        gamma = 1.0 + 0.1 * jax.random.normal(ks[2], (cout,), jnp.float32)
        beta = 0.1 * jax.random.normal(ks[3], (cout,), jnp.float32)
        mean = 0.1 * jax.random.normal(ks[4], (cout,), jnp.float32)
        var = 1.0 + 0.1 * jax.random.uniform(ks[5], (cout,), jnp.float32)
        scale = gamma / jnp.sqrt(var + eps)
        return w * scale[:, None, None, None], beta + (b - mean) * scale

    keys = jax.random.split(key, num_layer + 1)
    wh, bh = conv_block(keys[0], nc_current, nfc)                          # head
    body = [conv_block(keys[i], nfc, nfc) for i in range(1, num_layer)]    # num_layer-1 blocks
    wb = jnp.stack([w for w, _ in body])
    bb = jnp.stack([b for _, b in body])
    kt = jax.random.split(keys[num_layer], 2)
    wt = 0.1 * jax.random.normal(kt[0], (1, nfc, ker, ker), jnp.float32)   # tail Conv2d, OIHW
    bt = 0.1 * jax.random.normal(kt[1], (1,), jnp.float32)
    return wh, bh, wb, bb, wt, bt


def _reference_forward(x_nchw, params):
    """Plain-XLA reference (lax.conv, f32) of the same folded network."""
    wh, bh, wb, bb, wt, bt = params

    def conv(x, w_oihw, b, act):
        y = jax.lax.conv_general_dilated(
            x, w_oihw, window_strides=(1, 1), padding="VALID",
            dimension_numbers=("NCHW", "OIHW", "NCHW"),
            precision=jax.lax.Precision.HIGHEST)
        y = y + b.reshape(1, -1, 1, 1)
        return jnp.where(y > 0, y, 0.2 * y) if act else y

    y = conv(x_nchw, wh, bh, True)
    for i in range(wb.shape[0]):
        y = conv(y, wb[i], bb[i], True)
    return conv(y, wt, bt, False)


if __name__ == "__main__":
    key = jax.random.PRNGKey(0)
    kx, kp = jax.random.split(key)
    # opt: nc_current=4, nfc=32, ker_size=3, num_layer=3, 2D level_shape
    x = jax.random.normal(kx, (2, 4, 16, 16), jnp.float32)     # NCHW, like PyTorch
    params = init_params(kp, nc_current=4, nfc=32, ker=3, num_layer=3)

    out = level_wdiscriminator(x, params)
    jax.block_until_ready(out)

    # 4 VALID 3x3 convs: 16 -> 14 -> 12 -> 10 -> 8 spatially, channels -> 1
    assert out.shape == (2, 1, 8, 8), out.shape
    assert bool(jnp.all(jnp.isfinite(out)))

    # Correctness vs. plain-XLA f32 conv of the same folded network.  Tolerance is
    # loose because kernel matmul operands (input/weights/activations) are bf16 with
    # f32 accumulation; f32 parity would require f32-operand matmuls.
    ref = _reference_forward(x, params)
    max_err = float(jnp.max(jnp.abs(out - ref)))
    assert max_err < 2e-1, max_err

    print("KERNEL_OK")
</pallas_src>

<mosaic_0001>
module attributes {stable_mosaic.version = 11 : i64} {
  func.func @kernel(%arg0: i32, %arg1: memref<1x16x264xbf16, #tpu.memory_space<vmem>>, %arg2: memref<32x144xbf16, #tpu.memory_space<vmem>>, %arg3: memref<32x1xf32, #tpu.memory_space<vmem>>, %arg4: memref<2x32x288xbf16, #tpu.memory_space<vmem>>, %arg5: memref<2x32x1xf32, #tpu.memory_space<vmem>>, %arg6: memref<288x1xf32, #tpu.memory_space<vmem>>, %arg7: memref<1xf32, #tpu.memory_space<smem>>, %arg8: memref<1x1x128xf32, #tpu.memory_space<vmem>>, %arg9: memref<288x230xbf16, #tpu.memory_space<vmem>>, %arg10: memref<32x230xbf16, #tpu.memory_space<vmem>>, %arg11: memref<32x196xbf16, #tpu.memory_space<vmem>>, %arg12: memref<32x162xbf16, #tpu.memory_space<vmem>>) attributes {dimension_semantics = [#tpu.dimension_semantics<parallel>], iteration_bounds = array<i64: 2>, scalar_prefetch = 0 : i64, scratch_operands = 4 : i64, tpu.core_type = #tpu.core_type<tc>, window_params = [{transform_indices = @transform_0, window_bounds = array<i64: 1, 16, 264>}, {pipeline_mode = #tpu.pipeline_mode<synchronous>, transform_indices = @transform_1, window_bounds = array<i64: 32, 144>}, {pipeline_mode = #tpu.pipeline_mode<synchronous>, transform_indices = @transform_2, window_bounds = array<i64: 32, 1>}, {pipeline_mode = #tpu.pipeline_mode<synchronous>, transform_indices = @transform_3, window_bounds = array<i64: 2, 32, 288>}, {pipeline_mode = #tpu.pipeline_mode<synchronous>, transform_indices = @transform_4, window_bounds = array<i64: 2, 32, 1>}, {pipeline_mode = #tpu.pipeline_mode<synchronous>, transform_indices = @transform_5, window_bounds = array<i64: 288, 1>}, {transform_indices = @transform_6, window_bounds = array<i64: 1>}, {transform_indices = @transform_7, window_bounds = array<i64: 1, 1, 128>}]} {
    %c0 = arith.constant 0 : index
    %c0_0 = arith.constant 0 : index
    %c0_1 = arith.constant 0 : index
    %0 = vector.load %arg1[%c0, %c0_0, %c0_1] : memref<1x16x264xbf16, #tpu.memory_space<vmem>>, vector<1x16x264xbf16>
    %1 = vector.shape_cast %0 : vector<1x16x264xbf16> to vector<16x264xbf16>
    %2 = vector.extract_strided_slice %1 {offsets = [0, 0], sizes = [16, 230], strides = [1, 1]} : vector<16x264xbf16> to vector<16x230xbf16>
    %c0_2 = arith.constant 0 : index
    %c0_3 = arith.constant 0 : index
    %3 = vector.load %arg9[%c0_2, %c0_3] : memref<288x230xbf16, #tpu.memory_space<vmem>>, vector<16x230xbf16>
    tpu.vector_store %arg9[%c0_2, %c0_3], %2 {strides = array<i32>} : memref<288x230xbf16, #tpu.memory_space<vmem>>, vector<16x230xbf16>,
    %4 = vector.extract_strided_slice %1 {offsets = [0, 1], sizes = [16, 230], strides = [1, 1]} : vector<16x264xbf16> to vector<16x230xbf16>
    %c16 = arith.constant 16 : index
    %c0_4 = arith.constant 0 : index
    %5 = vector.load %arg9[%c16, %c0_4] : memref<288x230xbf16, #tpu.memory_space<vmem>>, vector<16x230xbf16>
    tpu.vector_store %arg9[%c16, %c0_4], %4 {strides = array<i32>} : memref<288x230xbf16, #tpu.memory_space<vmem>>, vector<16x230xbf16>,
    %6 = vector.extract_strided_slice %1 {offsets = [0, 2], sizes = [16, 230], strides = [1, 1]} : vector<16x264xbf16> to vector<16x230xbf16>
    %c32 = arith.constant 32 : index
    %c0_5 = arith.constant 0 : index
    %7 = vector.load %arg9[%c32, %c0_5] : memref<288x230xbf16, #tpu.memory_space<vmem>>, vector<16x230xbf16>
    tpu.vector_store %arg9[%c32, %c0_5], %6 {strides = array<i32>} : memref<288x230xbf16, #tpu.memory_space<vmem>>, vector<16x230xbf16>,
    %8 = vector.extract_strided_slice %1 {offsets = [0, 16], sizes = [16, 230], strides = [1, 1]} : vector<16x264xbf16> to vector<16x230xbf16>
    %c48 = arith.constant 48 : index
    %c0_6 = arith.constant 0 : index
    %9 = vector.load %arg9[%c48, %c0_6] : memref<288x230xbf16, #tpu.memory_space<vmem>>, vector<16x230xbf16>
    tpu.vector_store %arg9[%c48, %c0_6], %8 {strides = array<i32>} : memref<288x230xbf16, #tpu.memory_space<vmem>>, vector<16x230xbf16>,
    %10 = vector.extract_strided_slice %1 {offsets = [0, 17], sizes = [16, 230], strides = [1, 1]} : vector<16x264xbf16> to vector<16x230xbf16>
    %c64 = arith.constant 64 : index
    %c0_7 = arith.constant 0 : index
    %11 = vector.load %arg9[%c64, %c0_7] : memref<288x230xbf16, #tpu.memory_space<vmem>>, vector<16x230xbf16>
    tpu.vector_store %arg9[%c64, %c0_7], %10 {strides = array<i32>} : memref<288x230xbf16, #tpu.memory_space<vmem>>, vector<16x230xbf16>,
    %12 = vector.extract_strided_slice %1 {offsets = [0, 18], sizes = [16, 230], strides = [1, 1]} : vector<16x264xbf16> to vector<16x230xbf16>
    %c80 = arith.constant 80 : index
    %c0_8 = arith.constant 0 : index
    %13 = vector.load %arg9[%c80, %c0_8] : memref<288x230xbf16, #tpu.memory_space<vmem>>, vector<16x230xbf16>
    tpu.vector_store %arg9[%c80, %c0_8], %12 {strides = array<i32>} : memref<288x230xbf16, #tpu.memory_space<vmem>>, vector<16x230xbf16>,
    %14 = vector.extract_strided_slice %1 {offsets = [0, 32], sizes = [16, 230], strides = [1, 1]} : vector<16x264xbf16> to vector<16x230xbf16>
    %c96 = arith.constant 96 : index
    %c0_9 = arith.constant 0 : index
    %15 = vector.load %arg9[%c96, %c0_9] : memref<288x230xbf16, #tpu.memory_space<vmem>>, vector<16x230xbf16>
    tpu.vector_store %arg9[%c96, %c0_9], %14 {strides = array<i32>} : memref<288x230xbf16, #tpu.memory_space<vmem>>, vector<16x230xbf16>,
    %16 = vector.extract_strided_slice %1 {offsets = [0, 33], sizes = [16, 230], strides = [1, 1]} : vector<16x264xbf16> to vector<16x230xbf16>
    %c112 = arith.constant 112 : index
    %c0_10 = arith.constant 0 : index
    %17 = vector.load %arg9[%c112, %c0_10] : memref<288x230xbf16, #tpu.memory_space<vmem>>, vector<16x230xbf16>
    tpu.vector_store %arg9[%c112, %c0_10], %16 {strides = array<i32>} : memref<288x230xbf16, #tpu.memory_space<vmem>>, vector<16x230xbf16>,
    %18 = vector.extract_strided_slice %1 {offsets = [0, 34], sizes = [16, 230], strides = [1, 1]} : vector<16x264xbf16> to vector<16x230xbf16>
    %c128 = arith.constant 128 : index
    %c0_11 = arith.constant 0 : index
    %19 = vector.load %arg9[%c128, %c0_11] : memref<288x230xbf16, #tpu.memory_space<vmem>>, vector<16x230xbf16>
    tpu.vector_store %arg9[%c128, %c0_11], %18 {strides = array<i32>} : memref<288x230xbf16, #tpu.memory_space<vmem>>, vector<16x230xbf16>,
    %c0_12 = arith.constant 0 : index
    %c0_13 = arith.constant 0 : index
    %20 = vector.load %arg9[%c0_12, %c0_13] : memref<288x230xbf16, #tpu.memory_space<vmem>>, vector<144x230xbf16>
    %c0_14 = arith.constant 0 : index
    %c0_15 = arith.constant 0 : index
    %21 = vector.load %arg2[%c0_14, %c0_15] : memref<32x144xbf16, #tpu.memory_space<vmem>>, vector<32x144xbf16>
    %cst = arith.constant dense<0.000000e+00> : vector<32x230xf32>
    %22 = tpu.matmul %21, %20, %cst {dimension_numbers = #tpu.dot_dimension_numbers<[1], [0], [0], [1], [0, 0, 1, 1], [], []>} : vector<32x144xbf16>, vector<144x230xbf16>, vector<32x230xf32> -> vector<32x230xf32>
    %c0_16 = arith.constant 0 : index
    %c0_17 = arith.constant 0 : index
    %23 = vector.load %arg3[%c0_16, %c0_17] : memref<32x1xf32, #tpu.memory_space<vmem>>, vector<32x1xf32>
    %24 = vector.broadcast %23 : vector<32x1xf32> to vector<32x230xf32>
    %25 = arith.addf %22, %24 : vector<32x230xf32>
    %cst_18 = arith.constant 2.000000e-01 : f32
    %26 = vector.broadcast %cst_18 : f32 to vector<32x230xf32>
    %27 = arith.mulf %26, %25 : vector<32x230xf32>
    %28 = arith.maximumf %25, %27 : vector<32x230xf32>
    %29 = arith.truncf %28 : vector<32x230xf32> to vector<32x230xbf16>
    %c0_19 = arith.constant 0 : index
    %c0_20 = arith.constant 0 : index
    %30 = vector.load %arg10[%c0_19, %c0_20] : memref<32x230xbf16, #tpu.memory_space<vmem>>, vector<32x230xbf16>
    tpu.vector_store %arg10[%c0_19, %c0_20], %29 {strides = array<i32>} : memref<32x230xbf16, #tpu.memory_space<vmem>>, vector<32x230xbf16>,
    %c0_21 = arith.constant 0 : index
    %c0_22 = arith.constant 0 : index
    %31 = vector.load %arg10[%c0_21, %c0_22] : memref<32x230xbf16, #tpu.memory_space<vmem>>, vector<32x230xbf16>
    %32 = vector.extract_strided_slice %31 {offsets = [0, 0], sizes = [32, 196], strides = [1, 1]} : vector<32x230xbf16> to vector<32x196xbf16>
    %c0_23 = arith.constant 0 : index
    %c0_24 = arith.constant 0 : index
    %33 = vector.load %arg9[%c0_23, %c0_24] : memref<288x230xbf16, #tpu.memory_space<vmem>>, vector<32x196xbf16>
    tpu.vector_store %arg9[%c0_23, %c0_24], %32 {strides = array<i32>} : memref<288x230xbf16, #tpu.memory_space<vmem>>, vector<32x196xbf16>,
    %34 = vector.extract_strided_slice %31 {offsets = [0, 1], sizes = [32, 196], strides = [1, 1]} : vector<32x230xbf16> to vector<32x196xbf16>
    %c32_25 = arith.constant 32 : index
    %c0_26 = arith.constant 0 : index
    %35 = vector.load %arg9[%c32_25, %c0_26] : memref<288x230xbf16, #tpu.memory_space<vmem>>, vector<32x196xbf16>
    tpu.vector_store %arg9[%c32_25, %c0_26], %34 {strides = array<i32>} : memref<288x230xbf16, #tpu.memory_space<vmem>>, vector<32x196xbf16>,
    %36 = vector.extract_strided_slice %31 {offsets = [0, 2], sizes = [32, 196], strides = [1, 1]} : vector<32x230xbf16> to vector<32x196xbf16>
    %c64_27 = arith.constant 64 : index
    %c0_28 = arith.constant 0 : index
    %37 = vector.load %arg9[%c64_27, %c0_28] : memref<288x230xbf16, #tpu.memory_space<vmem>>, vector<32x196xbf16>
    tpu.vector_store %arg9[%c64_27, %c0_28], %36 {strides = array<i32>} : memref<288x230xbf16, #tpu.memory_space<vmem>>, vector<32x196xbf16>,
    %38 = vector.extract_strided_slice %31 {offsets = [0, 16], sizes = [32, 196], strides = [1, 1]} : vector<32x230xbf16> to vector<32x196xbf16>
    %c96_29 = arith.constant 96 : index
    %c0_30 = arith.constant 0 : index
    %39 = vector.load %arg9[%c96_29, %c0_30] : memref<288x230xbf16, #tpu.memory_space<vmem>>, vector<32x196xbf16>
    tpu.vector_store %arg9[%c96_29, %c0_30], %38 {strides = array<i32>} : memref<288x230xbf16, #tpu.memory_space<vmem>>, vector<32x196xbf16>,
    %40 = vector.extract_strided_slice %31 {offsets = [0, 17], sizes = [32, 196], strides = [1, 1]} : vector<32x230xbf16> to vector<32x196xbf16>
    %c128_31 = arith.constant 128 : index
    %c0_32 = arith.constant 0 : index
    %41 = vector.load %arg9[%c128_31, %c0_32] : memref<288x230xbf16, #tpu.memory_space<vmem>>, vector<32x196xbf16>
    tpu.vector_store %arg9[%c128_31, %c0_32], %40 {strides = array<i32>} : memref<288x230xbf16, #tpu.memory_space<vmem>>, vector<32x196xbf16>,
    %42 = vector.extract_strided_slice %31 {offsets = [0, 18], sizes = [32, 196], strides = [1, 1]} : vector<32x230xbf16> to vector<32x196xbf16>
    %c160 = arith.constant 160 : index
    %c0_33 = arith.constant 0 : index
    %43 = vector.load %arg9[%c160, %c0_33] : memref<288x230xbf16, #tpu.memory_space<vmem>>, vector<32x196xbf16>
    tpu.vector_store %arg9[%c160, %c0_33], %42 {strides = array<i32>} : memref<288x230xbf16, #tpu.memory_space<vmem>>, vector<32x196xbf16>,
    %44 = vector.extract_strided_slice %31 {offsets = [0, 32], sizes = [32, 196], strides = [1, 1]} : vector<32x230xbf16> to vector<32x196xbf16>
    %c192 = arith.constant 192 : index
    %c0_34 = arith.constant 0 : index
    %45 = vector.load %arg9[%c192, %c0_34] : memref<288x230xbf16, #tpu.memory_space<vmem>>, vector<32x196xbf16>
    tpu.vector_store %arg9[%c192, %c0_34], %44 {strides = array<i32>} : memref<288x230xbf16, #tpu.memory_space<vmem>>, vector<32x196xbf16>,
    %46 = vector.extract_strided_slice %31 {offsets = [0, 33], sizes = [32, 196], strides = [1, 1]} : vector<32x230xbf16> to vector<32x196xbf16>
    %c224 = arith.constant 224 : index
    %c0_35 = arith.constant 0 : index
    %47 = vector.load %arg9[%c224, %c0_35] : memref<288x230xbf16, #tpu.memory_space<vmem>>, vector<32x196xbf16>
    tpu.vector_store %arg9[%c224, %c0_35], %46 {strides = array<i32>} : memref<288x230xbf16, #tpu.memory_space<vmem>>, vector<32x196xbf16>,
    %48 = vector.extract_strided_slice %31 {offsets = [0, 34], sizes = [32, 196], strides = [1, 1]} : vector<32x230xbf16> to vector<32x196xbf16>
    %c256 = arith.constant 256 : index
    %c0_36 = arith.constant 0 : index
    %49 = vector.load %arg9[%c256, %c0_36] : memref<288x230xbf16, #tpu.memory_space<vmem>>, vector<32x196xbf16>
    tpu.vector_store %arg9[%c256, %c0_36], %48 {strides = array<i32>} : memref<288x230xbf16, #tpu.memory_space<vmem>>, vector<32x196xbf16>,
    %c0_37 = arith.constant 0 : index
    %c0_38 = arith.constant 0 : index
    %50 = vector.load %arg9[%c0_37, %c0_38] : memref<288x230xbf16, #tpu.memory_space<vmem>>, vector<288x196xbf16>
    %c0_39 = arith.constant 0 : index
    %c0_40 = arith.constant 0 : index
    %c0_41 = arith.constant 0 : index
    %51 = vector.load %arg4[%c0_39, %c0_40, %c0_41] : memref<2x32x288xbf16, #tpu.memory_space<vmem>>, vector<1x32x288xbf16>
    %52 = vector.shape_cast %51 : vector<1x32x288xbf16> to vector<32x288xbf16>
    %cst_42 = arith.constant dense<0.000000e+00> : vector<32x196xf32>
    %53 = tpu.matmul %52, %50, %cst_42 {dimension_numbers = #tpu.dot_dimension_numbers<[1], [0], [0], [1], [0, 0, 1, 1], [], []>} : vector<32x288xbf16>, vector<288x196xbf16>, vector<32x196xf32> -> vector<32x196xf32>
    %c0_43 = arith.constant 0 : index
    %c0_44 = arith.constant 0 : index
    %c0_45 = arith.constant 0 : index
    %54 = vector.load %arg5[%c0_43, %c0_44, %c0_45] : memref<2x32x1xf32, #tpu.memory_space<vmem>>, vector<1x32x1xf32>
    %55 = vector.shape_cast %54 : vector<1x32x1xf32> to vector<32x1xf32>
    %56 = vector.broadcast %55 : vector<32x1xf32> to vector<32x196xf32>
    %57 = arith.addf %53, %56 : vector<32x196xf32>
    %cst_46 = arith.constant 2.000000e-01 : f32
    %58 = vector.broadcast %cst_46 : f32 to vector<32x196xf32>
    %59 = arith.mulf %58, %57 : vector<32x196xf32>
    %60 = arith.maximumf %57, %59 : vector<32x196xf32>
    %61 = arith.truncf %60 : vector<32x196xf32> to vector<32x196xbf16>
    %c0_47 = arith.constant 0 : index
    %c0_48 = arith.constant 0 : index
    %62 = vector.load %arg11[%c0_47, %c0_48] : memref<32x196xbf16, #tpu.memory_space<vmem>>, vector<32x196xbf16>
    tpu.vector_store %arg11[%c0_47, %c0_48], %61 {strides = array<i32>} : memref<32x196xbf16, #tpu.memory_space<vmem>>, vector<32x196xbf16>,
    %c0_49 = arith.constant 0 : index
    %c0_50 = arith.constant 0 : index
    %63 = vector.load %arg11[%c0_49, %c0_50] : memref<32x196xbf16, #tpu.memory_space<vmem>>, vector<32x196xbf16>
    %64 = vector.extract_strided_slice %63 {offsets = [0, 0], sizes = [32, 162], strides = [1, 1]} : vector<32x196xbf16> to vector<32x162xbf16>
    %c0_51 = arith.constant 0 : index
    %c0_52 = arith.constant 0 : index
    %65 = vector.load %arg9[%c0_51, %c0_52] : memref<288x230xbf16, #tpu.memory_space<vmem>>, vector<32x162xbf16>
    tpu.vector_store %arg9[%c0_51, %c0_52], %64 {strides = array<i32>} : memref<288x230xbf16, #tpu.memory_space<vmem>>, vector<32x162xbf16>,
    %66 = vector.extract_strided_slice %63 {offsets = [0, 1], sizes = [32, 162], strides = [1, 1]} : vector<32x196xbf16> to vector<32x162xbf16>
    %c32_53 = arith.constant 32 : index
    %c0_54 = arith.constant 0 : index
    %67 = vector.load %arg9[%c32_53, %c0_54] : memref<288x230xbf16, #tpu.memory_space<vmem>>, vector<32x162xbf16>
    tpu.vector_store %arg9[%c32_53, %c0_54], %66 {strides = array<i32>} : memref<288x230xbf16, #tpu.memory_space<vmem>>, vector<32x162xbf16>,
    %68 = vector.extract_strided_slice %63 {offsets = [0, 2], sizes = [32, 162], strides = [1, 1]} : vector<32x196xbf16> to vector<32x162xbf16>
    %c64_55 = arith.constant 64 : index
    %c0_56 = arith.constant 0 : index
    %69 = vector.load %arg9[%c64_55, %c0_56] : memref<288x230xbf16, #tpu.memory_space<vmem>>, vector<32x162xbf16>
    tpu.vector_store %arg9[%c64_55, %c0_56], %68 {strides = array<i32>} : memref<288x230xbf16, #tpu.memory_space<vmem>>, vector<32x162xbf16>,
    %70 = vector.extract_strided_slice %63 {offsets = [0, 16], sizes = [32, 162], strides = [1, 1]} : vector<32x196xbf16> to vector<32x162xbf16>
    %c96_57 = arith.constant 96 : index
    %c0_58 = arith.constant 0 : index
    %71 = vector.load %arg9[%c96_57, %c0_58] : memref<288x230xbf16, #tpu.memory_space<vmem>>, vector<32x162xbf16>
    tpu.vector_store %arg9[%c96_57, %c0_58], %70 {strides = array<i32>} : memref<288x230xbf16, #tpu.memory_space<vmem>>, vector<32x162xbf16>,
    %72 = vector.extract_strided_slice %63 {offsets = [0, 17], sizes = [32, 162], strides = [1, 1]} : vector<32x196xbf16> to vector<32x162xbf16>
    %c128_59 = arith.constant 128 : index
    %c0_60 = arith.constant 0 : index
    %73 = vector.load %arg9[%c128_59, %c0_60] : memref<288x230xbf16, #tpu.memory_space<vmem>>, vector<32x162xbf16>
    tpu.vector_store %arg9[%c128_59, %c0_60], %72 {strides = array<i32>} : memref<288x230xbf16, #tpu.memory_space<vmem>>, vector<32x162xbf16>,
    %74 = vector.extract_strided_slice %63 {offsets = [0, 18], sizes = [32, 162], strides = [1, 1]} : vector<32x196xbf16> to vector<32x162xbf16>
    %c160_61 = arith.constant 160 : index
    %c0_62 = arith.constant 0 : index
    %75 = vector.load %arg9[%c160_61, %c0_62] : memref<288x230xbf16, #tpu.memory_space<vmem>>, vector<32x162xbf16>
    tpu.vector_store %arg9[%c160_61, %c0_62], %74 {strides = array<i32>} : memref<288x230xbf16, #tpu.memory_space<vmem>>, vector<32x162xbf16>,
    %76 = vector.extract_strided_slice %63 {offsets = [0, 32], sizes = [32, 162], strides = [1, 1]} : vector<32x196xbf16> to vector<32x162xbf16>
    %c192_63 = arith.constant 192 : index
    %c0_64 = arith.constant 0 : index
    %77 = vector.load %arg9[%c192_63, %c0_64] : memref<288x230xbf16, #tpu.memory_space<vmem>>, vector<32x162xbf16>
    tpu.vector_store %arg9[%c192_63, %c0_64], %76 {strides = array<i32>} : memref<288x230xbf16, #tpu.memory_space<vmem>>, vector<32x162xbf16>,
    %78 = vector.extract_strided_slice %63 {offsets = [0, 33], sizes = [32, 162], strides = [1, 1]} : vector<32x196xbf16> to vector<32x162xbf16>
    %c224_65 = arith.constant 224 : index
    %c0_66 = arith.constant 0 : index
    %79 = vector.load %arg9[%c224_65, %c0_66] : memref<288x230xbf16, #tpu.memory_space<vmem>>, vector<32x162xbf16>
    tpu.vector_store %arg9[%c224_65, %c0_66], %78 {strides = array<i32>} : memref<288x230xbf16, #tpu.memory_space<vmem>>, vector<32x162xbf16>,
    %80 = vector.extract_strided_slice %63 {offsets = [0, 34], sizes = [32, 162], strides = [1, 1]} : vector<32x196xbf16> to vector<32x162xbf16>
    %c256_67 = arith.constant 256 : index
    %c0_68 = arith.constant 0 : index
    %81 = vector.load %arg9[%c256_67, %c0_68] : memref<288x230xbf16, #tpu.memory_space<vmem>>, vector<32x162xbf16>
    tpu.vector_store %arg9[%c256_67, %c0_68], %80 {strides = array<i32>} : memref<288x230xbf16, #tpu.memory_space<vmem>>, vector<32x162xbf16>,
    %c0_69 = arith.constant 0 : index
    %c0_70 = arith.constant 0 : index
    %82 = vector.load %arg9[%c0_69, %c0_70] : memref<288x230xbf16, #tpu.memory_space<vmem>>, vector<288x162xbf16>
    %c1 = arith.constant 1 : index
    %c0_71 = arith.constant 0 : index
    %c0_72 = arith.constant 0 : index
    %83 = vector.load %arg4[%c1, %c0_71, %c0_72] : memref<2x32x288xbf16, #tpu.memory_space<vmem>>, vector<1x32x288xbf16>
    %84 = vector.shape_cast %83 : vector<1x32x288xbf16> to vector<32x288xbf16>
    %cst_73 = arith.constant dense<0.000000e+00> : vector<32x162xf32>
    %85 = tpu.matmul %84, %82, %cst_73 {dimension_numbers = #tpu.dot_dimension_numbers<[1], [0], [0], [1], [0, 0, 1, 1], [], []>} : vector<32x288xbf16>, vector<288x162xbf16>, vector<32x162xf32> -> vector<32x162xf32>
    %c1_74 = arith.constant 1 : index
    %c0_75 = arith.constant 0 : index
    %c0_76 = arith.constant 0 : index
    %86 = vector.load %arg5[%c1_74, %c0_75, %c0_76] : memref<2x32x1xf32, #tpu.memory_space<vmem>>, vector<1x32x1xf32>
    %87 = vector.shape_cast %86 : vector<1x32x1xf32> to vector<32x1xf32>
    %88 = vector.broadcast %87 : vector<32x1xf32> to vector<32x162xf32>
    %89 = arith.addf %85, %88 : vector<32x162xf32>
    %cst_77 = arith.constant 2.000000e-01 : f32
    %90 = vector.broadcast %cst_77 : f32 to vector<32x162xf32>
    %91 = arith.mulf %90, %89 : vector<32x162xf32>
    %92 = arith.maximumf %89, %91 : vector<32x162xf32>
    %93 = arith.truncf %92 : vector<32x162xf32> to vector<32x162xbf16>
    %c0_78 = arith.constant 0 : index
    %c0_79 = arith.constant 0 : index
    %94 = vector.load %arg12[%c0_78, %c0_79] : memref<32x162xbf16, #tpu.memory_space<vmem>>, vector<32x162xbf16>
    tpu.vector_store %arg12[%c0_78, %c0_79], %93 {strides = array<i32>} : memref<32x162xbf16, #tpu.memory_space<vmem>>, vector<32x162xbf16>,
    %c0_80 = arith.constant 0 : index
    %c0_81 = arith.constant 0 : index
    %95 = vector.load %arg12[%c0_80, %c0_81] : memref<32x162xbf16, #tpu.memory_space<vmem>>, vector<32x162xbf16>
    %96 = vector.extract_strided_slice %95 {offsets = [0, 0], sizes = [32, 128], strides = [1, 1]} : vector<32x162xbf16> to vector<32x128xbf16>
    %c0_82 = arith.constant 0 : index
    %c0_83 = arith.constant 0 : index
    %97 = vector.load %arg9[%c0_82, %c0_83] : memref<288x230xbf16, #tpu.memory_space<vmem>>, vector<32x128xbf16>
    tpu.vector_store %arg9[%c0_82, %c0_83], %96 {strides = array<i32>} : memref<288x230xbf16, #tpu.memory_space<vmem>>, vector<32x128xbf16>,
    %98 = vector.extract_strided_slice %95 {offsets = [0, 1], sizes = [32, 128], strides = [1, 1]} : vector<32x162xbf16> to vector<32x128xbf16>
    %c32_84 = arith.constant 32 : index
    %c0_85 = arith.constant 0 : index
    %99 = vector.load %arg9[%c32_84, %c0_85] : memref<288x230xbf16, #tpu.memory_space<vmem>>, vector<32x128xbf16>
    tpu.vector_store %arg9[%c32_84, %c0_85], %98 {strides = array<i32>} : memref<288x230xbf16, #tpu.memory_space<vmem>>, vector<32x128xbf16>,
    %100 = vector.extract_strided_slice %95 {offsets = [0, 2], sizes = [32, 128], strides = [1, 1]} : vector<32x162xbf16> to vector<32x128xbf16>
    %c64_86 = arith.constant 64 : index
    %c0_87 = arith.constant 0 : index
    %101 = vector.load %arg9[%c64_86, %c0_87] : memref<288x230xbf16, #tpu.memory_space<vmem>>, vector<32x128xbf16>
    tpu.vector_store %arg9[%c64_86, %c0_87], %100 {strides = array<i32>} : memref<288x230xbf16, #tpu.memory_space<vmem>>, vector<32x128xbf16>,
    %102 = vector.extract_strided_slice %95 {offsets = [0, 16], sizes = [32, 128], strides = [1, 1]} : vector<32x162xbf16> to vector<32x128xbf16>
    %c96_88 = arith.constant 96 : index
    %c0_89 = arith.constant 0 : index
    %103 = vector.load %arg9[%c96_88, %c0_89] : memref<288x230xbf16, #tpu.memory_space<vmem>>, vector<32x128xbf16>
    tpu.vector_store %arg9[%c96_88, %c0_89], %102 {strides = array<i32>} : memref<288x230xbf16, #tpu.memory_space<vmem>>, vector<32x128xbf16>,
    %104 = vector.extract_strided_slice %95 {offsets = [0, 17], sizes = [32, 128], strides = [1, 1]} : vector<32x162xbf16> to vector<32x128xbf16>
    %c128_90 = arith.constant 128 : index
    %c0_91 = arith.constant 0 : index
    %105 = vector.load %arg9[%c128_90, %c0_91] : memref<288x230xbf16, #tpu.memory_space<vmem>>, vector<32x128xbf16>
    tpu.vector_store %arg9[%c128_90, %c0_91], %104 {strides = array<i32>} : memref<288x230xbf16, #tpu.memory_space<vmem>>, vector<32x128xbf16>,
    %106 = vector.extract_strided_slice %95 {offsets = [0, 18], sizes = [32, 128], strides = [1, 1]} : vector<32x162xbf16> to vector<32x128xbf16>
    %c160_92 = arith.constant 160 : index
    %c0_93 = arith.constant 0 : index
    %107 = vector.load %arg9[%c160_92, %c0_93] : memref<288x230xbf16, #tpu.memory_space<vmem>>, vector<32x128xbf16>
    tpu.vector_store %arg9[%c160_92, %c0_93], %106 {strides = array<i32>} : memref<288x230xbf16, #tpu.memory_space<vmem>>, vector<32x128xbf16>,
    %108 = vector.extract_strided_slice %95 {offsets = [0, 32], sizes = [32, 128], strides = [1, 1]} : vector<32x162xbf16> to vector<32x128xbf16>
    %c192_94 = arith.constant 192 : index
    %c0_95 = arith.constant 0 : index
    %109 = vector.load %arg9[%c192_94, %c0_95] : memref<288x230xbf16, #tpu.memory_space<vmem>>, vector<32x128xbf16>
    tpu.vector_store %arg9[%c192_94, %c0_95], %108 {strides = array<i32>} : memref<288x230xbf16, #tpu.memory_space<vmem>>, vector<32x128xbf16>,
    %110 = vector.extract_strided_slice %95 {offsets = [0, 33], sizes = [32, 128], strides = [1, 1]} : vector<32x162xbf16> to vector<32x128xbf16>
    %c224_96 = arith.constant 224 : index
    %c0_97 = arith.constant 0 : index
    %111 = vector.load %arg9[%c224_96, %c0_97] : memref<288x230xbf16, #tpu.memory_space<vmem>>, vector<32x128xbf16>
    tpu.vector_store %arg9[%c224_96, %c0_97], %110 {strides = array<i32>} : memref<288x230xbf16, #tpu.memory_space<vmem>>, vector<32x128xbf16>,
    %112 = vector.extract_strided_slice %95 {offsets = [0, 34], sizes = [32, 128], strides = [1, 1]} : vector<32x162xbf16> to vector<32x128xbf16>
    %c256_98 = arith.constant 256 : index
    %c0_99 = arith.constant 0 : index
    %113 = vector.load %arg9[%c256_98, %c0_99] : memref<288x230xbf16, #tpu.memory_space<vmem>>, vector<32x128xbf16>
    tpu.vector_store %arg9[%c256_98, %c0_99], %112 {strides = array<i32>} : memref<288x230xbf16, #tpu.memory_space<vmem>>, vector<32x128xbf16>,
    %c0_100 = arith.constant 0 : index
    %c0_101 = arith.constant 0 : index
    %114 = vector.load %arg9[%c0_100, %c0_101] : memref<288x230xbf16, #tpu.memory_space<vmem>>, vector<288x128xbf16>
    %115 = arith.extf %114 : vector<288x128xbf16> to vector<288x128xf32>
    %c0_102 = arith.constant 0 : index
    %c0_103 = arith.constant 0 : index
    %116 = vector.load %arg6[%c0_102, %c0_103] : memref<288x1xf32, #tpu.memory_space<vmem>>, vector<288x1xf32>
    %117 = vector.broadcast %116 : vector<288x1xf32> to vector<288x128xf32>
    %118 = arith.mulf %115, %117 : vector<288x128xf32>
    %cst_104 = arith.constant dense<0.000000e+00> : vector<128xf32>
    %119 = vector.multi_reduction <add>, %118, %cst_104 [0] : vector<288x128xf32> to vector<128xf32>
    %120 = vector.shape_cast %119 : vector<128xf32> to vector<1x128xf32>
    %c0_105 = arith.constant 0 : index
    %121 = memref.load %arg7[%c0_105] : memref<1xf32, #tpu.memory_space<smem>>
    %122 = vector.broadcast %121 : f32 to vector<1x128xf32>
    %123 = arith.addf %120, %122 : vector<1x128xf32>
    %c0_106 = arith.constant 0 : index
    %c0_107 = arith.constant 0 : index
    %c0_108 = arith.constant 0 : index
    %124 = vector.load %arg8[%c0_106, %c0_107, %c0_108] : memref<1x1x128xf32, #tpu.memory_space<vmem>>, vector<1x1x128xf32>
    %125 = vector.shape_cast %124 : vector<1x1x128xf32> to vector<1x128xf32>
    %126 = vector.shape_cast %123 : vector<1x128xf32> to vector<1x1x128xf32>
    tpu.vector_store %arg8[%c0_106, %c0_107, %c0_108], %126 {strides = array<i32>} : memref<1x1x128xf32, #tpu.memory_space<vmem>>, vector<1x1x128xf32>,
    return
  }
  func.func @transform_0(%arg0: i32) -> (i32, i32, i32) {
    %c0_i32 = arith.constant 0 : i32
    %c0_i32_0 = arith.constant 0 : i32
    %c0_i32_1 = arith.constant 0 : i32
    return %arg0, %c0_i32, %c0_i32_0 : i32, i32, i32
  }
  func.func @transform_1(%arg0: i32) -> (i32, i32) {
    %c0_i32 = arith.constant 0 : i32
    %c0_i32_0 = arith.constant 0 : i32
    %c0_i32_1 = arith.constant 0 : i32
    return %c0_i32, %c0_i32_0 : i32, i32
  }
  func.func @transform_2(%arg0: i32) -> (i32, i32) {
    %c0_i32 = arith.constant 0 : i32
    %c0_i32_0 = arith.constant 0 : i32
    %c0_i32_1 = arith.constant 0 : i32
    return %c0_i32, %c0_i32_0 : i32, i32
  }
  func.func @transform_3(%arg0: i32) -> (i32, i32, i32) {
    %c0_i32 = arith.constant 0 : i32
    %c0_i32_0 = arith.constant 0 : i32
    %c0_i32_1 = arith.constant 0 : i32
    %c0_i32_2 = arith.constant 0 : i32
    return %c0_i32, %c0_i32_0, %c0_i32_1 : i32, i32, i32
  }
  func.func @transform_4(%arg0: i32) -> (i32, i32, i32) {
    %c0_i32 = arith.constant 0 : i32
    %c0_i32_0 = arith.constant 0 : i32
    %c0_i32_1 = arith.constant 0 : i32
    %c0_i32_2 = arith.constant 0 : i32
    return %c0_i32, %c0_i32_0, %c0_i32_1 : i32, i32, i32
  }
  func.func @transform_5(%arg0: i32) -> (i32, i32) {
    %c0_i32 = arith.constant 0 : i32
    %c0_i32_0 = arith.constant 0 : i32
    %c0_i32_1 = arith.constant 0 : i32
    return %c0_i32, %c0_i32_0 : i32, i32
  }
  func.func @transform_6(%arg0: i32) -> i32 {
    %c0_i32 = arith.constant 0 : i32
    %c0_i32_0 = arith.constant 0 : i32
    return %c0_i32 : i32
  }
  func.func @transform_7(%arg0: i32) -> (i32, i32, i32) {
    %c0_i32 = arith.constant 0 : i32
    %c0_i32_0 = arith.constant 0 : i32
    %c0_i32_1 = arith.constant 0 : i32
    return %arg0, %c0_i32, %c0_i32_0 : i32, i32, i32
  }
}

</mosaic_0001>

<bundles_post_ra>
// kernel: level_wdiscriminator.1
= control target key start
LH: loop header
LB: loop body
LE: loop exit
PB: predicated region body
PF: predicated region fallthrough
CT: control target
= control target key end

     0   :  { %s2968_s26 = smov 0   ;;  %s3750_s0 = inlined_call_operand.vmem [shape: bf16[2,16,264], index: 0, kind: input, shape index: {}]   ;;  %s3751_s1 = inlined_call_operand.vmem [shape: bf16[32,144], index: 1, kind: input, shape index: {}]   ;;  %s3752_s2 = inlined_call_operand.vmem [shape: f32[32,1], index: 2, kind: input, shape index: {}]   ;;  %s3753_s3 = inlined_call_operand.vmem [shape: bf16[2,32,288], index: 3, kind: input, shape index: {}]   ;;  %s3754_s4 = inlined_call_operand.vmem [shape: f32[2,32,1], index: 4, kind: input, shape index: {}]   ;;  %s3755_s5 = inlined_call_operand.vmem [shape: f32[288,1], index: 5, kind: input, shape index: {}]   ;;  %s3756_s6 = inlined_call_operand.<no memory space> [shape: f32[1], index: 6, kind: input, shape index: {}]   ;;  %s3757_s7 = inlined_call_operand.vmem [shape: f32[2,1,128], index: 7, kind: output, shape index: {}]  }
   0x1   :  { %12 = sst [smem:[#allocation6]] %s3756_s6 }
   0x2 LB: > { %s2580_s27 = sadd.s32 4294967295, %s2914_s26   ;;  %p2584_p0 = scmp.ge.s32.totalorder %s2914_s26, 1  ;;  %s2914_s26 = sphi %s2968_s26, %s18_s26  }
   0x3   : > { %p238_p1 = scmp.lt.s32.totalorder %s2914_s26, 3 }
   0x5   : > { %p239_p2 = pnand %p2584_p0, %p238_p1 }
   0x6   : > { %p268_p3 = scmp.lt.s32.totalorder (!%p239_p2), %s2580_s27, 1  ;;  %s2916_s8 = smov (!%p239_p2), 95  }
   0x7   : > { %242 = sbr.rel (%p239_p2) target bundleno = 1520 (0x5f0), region = 48  ;;  %s2917_s9 = smov (!%p239_p2), 96  }
   0x8   : > { %s2918_s10 = smov (!%p239_p2), 110   ;;  %s2919_s11 = smov (!%p239_p2), 111  }
   0x9   : > { %s2920_s12 = smov (!%p239_p2), 112   ;;  %s2921_s13 = smov (!%p239_p2), 126  }
   0xa   : > { %s2922_s14 = smov (!%p239_p2), 127   ;;  %s2923_s15 = smov (!%p239_p2), 94  }
   0xc   : > { %s3765_s27 = smov (!%p268_p3, %s2580_s27), 1  ;;  %vm281_vm0 = vcmask 1043456   ;;  %vm282_vm1 = vcmask 834564   ;;  %v2782_v5 = vld [vmem:[%s3751_s1 + $0x4] ss:$8 sps:$4 sm:$0xff]   ;;  %vm573_vm3 = vcmask 130048  }
   0xd   : > { %s2736_s6 = smul.u32 24, %s3765_s27  ;;  %vm2980_vm2 = vmor %vm282_vm1, %vm281_vm0  ;;  %2608 = vmatprep.mubr.msk.bf16.mxu0 %vm573_vm3, %v2782_v5  ;;  %v444_v6 = vld [vmem:[%s3752_s2 + $0x18] sm:$0xff]  ;;  %v443_v7 = vld [vmem:[%s3752_s2 + $0x10] sm:$0xff]  ;;  %v2924_v8 = vmov 0   ;;  %vm390_vm4 = vcmask 777216   ;;  %vm369_vm5 = vcmask 785408   ;;  %s275_s23 = scalar_lea.vmem %s3757_s7, %s3765_s27 }
   0xe   : > { %2755 = vset.pattern.permute.xlu1 %v2924_v8  ;;  %2754 = vset.pattern.permute.xlu0 %v2924_v8  ;;  %v441_v9 = vld [vmem:[%s3752_s2] sm:$0xff]  ;;  %v442_v10 = vld [vmem:[%s3752_s2 + $0x8] sm:$0xff]  ;;  %vm346_vm6 = vcmask 900096   ;;  %vm333_vm7 = vcmask 908288   ;;  %vm320_vm8 = vcmask 916480   ;;  %vm307_vm9 = vcmask 1031168  }
   0xf   : > { %s272_s30 = scalar_lea.vmem %s3750_s0, %s2736_s6  ;;  %vm294_vm10 = vcmask 1039360   ;;  %vm411_vm11 = vcmask 769024   ;;  %vm681_vm12 = vcmask 556036   ;;  %v929_v0 = vld [vmem:[%s3754_s4 + $0x10] sm:$0xff]  ;;  %vm1161_vm14 = vcmask 261120  }
  0x10   : > { %v279_v1 = vld [vmem:[%s272_s30 + $0xc] sm:$0xff]  ;;  %v277_v2 = vld [vmem:[%s272_s30] sm:$0xff]  ;;  %v280_v3 = vld [vmem:[%s272_s30 + $0x14] sm:$0xf]  ;;  %vm1322_vm15 = vcmask 277508  }
  0x11   : > { %381 = vrot.lane.b32.xlu1 %v279_v1, %s2916_s8  ;;  %377 = vrot.lane.b32.xlu0 %v277_v2, %s2916_s8  ;;  %v278_v4 = vld [vmem:[%s272_s30 + $0x8] sm:$0xf]  ;;  %284 = vst.msk [vmem:[#allocation2] sm:$0xff] %vm2980_vm2, %v277_v2  ;;  %285 = vst.msk [vmem:[#allocation2 + $0x8] sm:$0xff] %vm2980_vm2, %v279_v1 }
  0x12   : > { %vm3100_vm13 = vmor %vm681_vm12, %vm281_vm0 }
  0x13   : > { %vm3284_vm1 = vmor %vm1322_vm15, %vm281_vm0 }
  0x15   : > { %383 = vrot.lane.b32.xlu1 %v280_v3, %s2916_s8  ;;  %379 = vrot.lane.b32.xlu0 %v278_v4, %s2916_s8 }
  0x19   : > { %357 = vrot.lane.b32.xlu1 %v278_v4, %s2917_s9  ;;  %355 = vrot.lane.b32.xlu0 %v277_v2, %s2917_s9 }
  0x1d   : > { %361 = vrot.lane.b32.xlu1 %v280_v3, %s2917_s9  ;;  %359 = vrot.lane.b32.xlu0 %v279_v1, %s2917_s9 }
  0x21   : > { %342 = vrot.lane.b32.xlu1 %v279_v1, %s2918_s10  ;;  %340 = vrot.lane.b32.xlu0 %v277_v2, %s2918_s10 }
  0x25   : > { %329 = vrot.lane.b32.xlu1 %v279_v1, %s2919_s11  ;;  %327 = vrot.lane.b32.xlu0 %v277_v2, %s2919_s11 }
  0x29   : > { %316 = vrot.lane.b32.xlu1 %v279_v1, %s2920_s12  ;;  %314 = vrot.lane.b32.xlu0 %v277_v2, %s2920_s12 }
  0x2d   : > { %303 = vrot.lane.b32.xlu1 %v279_v1, %s2921_s13  ;;  %301 = vrot.lane.b32.xlu0 %v277_v2, %s2921_s13 }
  0x31   : > { %290 = vrot.lane.b32.xlu1 %v279_v1, %s2922_s14  ;;  %288 = vrot.lane.b32.xlu0 %v277_v2, %s2922_s14 }
  0x35   : > { %400 = vrot.lane.b32.xlu1 %v278_v4, %s2923_s15  ;;  %398 = vrot.lane.b32.xlu0 %v277_v2, %s2923_s15 }
  0x39   : > { %404 = vrot.lane.b32.xlu1 %v280_v3, %s2923_s15  ;;  %402 = vrot.lane.b32.xlu0 %v279_v1, %s2923_s15 }
  0x3d   : > { %462 = vperm.xlu1 %2755, %v444_v6   ;;  %457 = vperm.xlu0 %2754, %v443_v7  }
  0x41   : > { %447 = vperm.xlu1 %2755, %v441_v9   ;;  %452 = vperm.xlu0 %2754, %v442_v10  }
  0x83   : > { %v382_v11 = vpop.permute.xlu1 %381  ;;  %v378_v12 = vpop.permute.xlu0 %377 }
  0x84   : > { %v387_v15 = vrot.slane %v382_v11, 4  ;;  %v385_v16 = vrot.slane %v378_v12, 4 }
  0x87   : > { %v384_v13 = vpop.permute.xlu1 %383  ;;  %v380_v14 = vpop.permute.xlu0 %379 }
  0x88   : > { %v388_v17 = vrot.slane %v384_v13, 4  ;;  %v386_v18 = vrot.slane %v380_v14, 4 }
  0x8a   : > { %v392_v19 = vsel %vm281_vm0, %v387_v15, %v388_v17  ;;  %v389_v20 = vsel %vm281_vm0, %v385_v16, %v386_v18 }
  0x8b   : > { %v393_v21 = vsel %vm390_vm4, %v382_v11, %v392_v19  ;;  %v391_v22 = vsel %vm390_vm4, %v378_v12, %v389_v20  ;;  %v358_v23 = vpop.permute.xlu1 %357  ;;  %v356_v24 = vpop.permute.xlu0 %355 }
  0x8c   : > { %397 = vst.msk [vmem:[#allocation2 + $0x78] sm:$0xff] %vm2980_vm2, %v393_v21  ;;  %396 = vst.msk [vmem:[#allocation2 + $0x70] sm:$0xff] %vm2980_vm2, %v391_v22  ;;  %v364_v25 = vrot.slane %v358_v23, 4  ;;  %v363_v26 = vrot.slane %v356_v24, 4 }
  0x8e   : > { %v368_v27 = vsel %vm281_vm0, %v363_v26, %v364_v25 }
  0x8f   : > { %v370_v28 = vsel %vm369_vm5, %v356_v24, %v368_v27  ;;  %v362_v29 = vpop.permute.xlu1 %361  ;;  %v360_v30 = vpop.permute.xlu0 %359 }
  0x90   : > { %375 = vst.msk [vmem:[#allocation2 + $0x60] sm:$0xff] %vm2980_vm2, %v370_v28  ;;  %v366_v31 = vrot.slane %v362_v29, 4  ;;  %v365_v32 = vrot.slane %v360_v30, 4 }
  0x92   : > { %v371_v33 = vsel %vm281_vm0, %v365_v32, %v366_v31 }
  0x93   : > { %v372_v34 = vsel %vm369_vm5, %v360_v30, %v371_v33  ;;  %v343_v35 = vpop.permute.xlu1 %342  ;;  %v341_v36 = vpop.permute.xlu0 %340  ;;  %v433_v37 = vld [vmem:[#allocation2 + $0x70] sm:$0xff]  ;;  %v434_v38 = vld [vmem:[#allocation2 + $0x78] sm:$0xff] }
  0x94   : > { %v2756_v39 = vld [vmem:[#allocation2 + $0x74] ss:$8 sps:$4 sm:$0xff]   ;;  %376 = vst.msk [vmem:[#allocation2 + $0x68] sm:$0xff] %vm2980_vm2, %v372_v34  ;;  %v345_v40 = vrot.slane %v343_v35, 4  ;;  %v344_v41 = vrot.slane %v341_v36, 4  ;;  %v2604_v42 = vcombine.low %v433_v37, %v434_v38 }
  0x95   : > { %580 = vmatprep.subr.bf16.mxu0 %v2756_v39  ;;  %v2774_v34 = vld [vmem:[#allocation2 + $0x4] ss:$8 sps:$4 sm:$0xff]   ;;  %v2780_v39 = vld [vmem:[%s3751_s1] ss:$8 sps:$4 sm:$0xff]  }
  0x96   : > { %v348_v43 = vsel %vm346_vm6, %v343_v35, %v345_v40  ;;  %v347_v44 = vsel %vm346_vm6, %v341_v36, %v344_v41  ;;  %581 = vmatpush1.bf16.msra.mxu0 %v2604_v42  ;;  %v2776_v36 = vld [vmem:[#allocation2] ss:$8 sps:$4 sm:$0xff]   ;;  %v2783_v40 = vld [vmem:[%s3751_s1 + $0x14] ss:$8 sps:$4 sm:$0xff]   ;;  %v2785_v41 = vld [vmem:[%s3751_s1 + $0x10] ss:$8 sps:$4 sm:$0xff]  }
  0x97   : > { %352 = vst.msk [vmem:[#allocation2 + $0x58] sm:$0xff] %vm2980_vm2, %v348_v43  ;;  %351 = vst.msk [vmem:[#allocation2 + $0x50] sm:$0xff] %vm2980_vm2, %v347_v44  ;;  %v330_v45 = vpop.permute.xlu1 %329  ;;  %v328_v46 = vpop.permute.xlu0 %327  ;;  %v431_v53 = vld [vmem:[#allocation2 + $0x60] sm:$0xff] }
  0x98   : > { %v332_v47 = vrot.slane %v330_v45, 4  ;;  %v331_v48 = vrot.slane %v328_v46, 4 }
  0x9a   : > { %v335_v49 = vsel %vm333_vm7, %v330_v45, %v332_v47  ;;  %v334_v50 = vsel %vm333_vm7, %v328_v46, %v331_v48 }
  0x9b   : > { %339 = vst.msk [vmem:[#allocation2 + $0x48] sm:$0xff] %vm2980_vm2, %v335_v49  ;;  %338 = vst.msk [vmem:[#allocation2 + $0x40] sm:$0xff] %vm2980_vm2, %v334_v50  ;;  %v317_v51 = vpop.permute.xlu1 %316  ;;  %v315_v52 = vpop.permute.xlu0 %314  ;;  %v432_v54 = vld [vmem:[#allocation2 + $0x68] sm:$0xff] }
  0x9c   : > { %v2758_v55 = vld [vmem:[#allocation2 + $0x64] ss:$8 sps:$4 sm:$0xff]   ;;  %v319_v56 = vrot.slane %v317_v51, 4  ;;  %v318_v57 = vrot.slane %v315_v52, 4  ;;  %v2602_v58 = vcombine.low %v431_v53, %v432_v54 }
  0x9d   : > { %582 = vmatprep.subr.bf16.mxu0 %v2758_v55 }
  0x9e   : > { %v322_v59 = vsel %vm320_vm8, %v317_v51, %v319_v56  ;;  %v321_v60 = vsel %vm320_vm8, %v315_v52, %v318_v57  ;;  %583 = vmatpush1.bf16.msra.mxu0 %v2602_v58  ;;  %v429_v61 = vld [vmem:[#allocation2 + $0x50] sm:$0xff]  ;;  %v430_v62 = vld [vmem:[#allocation2 + $0x58] sm:$0xff] }
  0x9f   : > { %v2760_v63 = vld [vmem:[#allocation2 + $0x54] ss:$8 sps:$4 sm:$0xff]   ;;  %326 = vst.msk [vmem:[#allocation2 + $0x38] sm:$0xff] %vm2980_vm2, %v322_v59  ;;  %325 = vst.msk [vmem:[#allocation2 + $0x30] sm:$0xff] %vm2980_vm2, %v321_v60  ;;  %v304_v1 = vpop.permute.xlu1 %303  ;;  %v302_v2 = vpop.permute.xlu0 %301  ;;  %v2600_v3 = vcombine.low %v429_v61, %v430_v62 }
  0xa0   : > { %v306_v4 = vrot.slane %v304_v1, 4  ;;  %v305_v5 = vrot.slane %v302_v2, 4  ;;  %584 = vmatprep.subr.bf16.mxu0 %v2760_v63 }
  0xa2   : > { %v309_v6 = vsel %vm307_vm9, %v304_v1, %v306_v4  ;;  %v308_v7 = vsel %vm307_vm9, %v302_v2, %v305_v5  ;;  %585 = vmatpush1.bf16.msra.mxu0 %v2600_v3  ;;  %v2762_v9 = vld [vmem:[#allocation2 + $0x44] ss:$8 sps:$4 sm:$0xff]   ;;  %v2764_v14 = vld [vmem:[#allocation2 + $0x40] ss:$8 sps:$4 sm:$0xff]  }
  0xa3   : > { %313 = vst.msk [vmem:[#allocation2 + $0x28] sm:$0xff] %vm2980_vm2, %v309_v6  ;;  %312 = vst.msk [vmem:[#allocation2 + $0x20] sm:$0xff] %vm2980_vm2, %v308_v7  ;;  %v291_v10 = vpop.permute.xlu1 %290  ;;  %v289_v11 = vpop.permute.xlu0 %288  ;;  %586 = vmatprep.subr.bf16.mxu0 %v2762_v9 }
  0xa4   : > { %v293_v12 = vrot.slane %v291_v10, 4  ;;  %v292_v13 = vrot.slane %v289_v11, 4 }
  0xa6   : > { %v296_v15 = vsel %vm294_vm10, %v291_v10, %v293_v12  ;;  %v295_v16 = vsel %vm294_vm10, %v289_v11, %v292_v13  ;;  %587 = vmatpush1.bf16.msra.mxu0 %v2764_v14  ;;  %v2765_v17 = vld [vmem:[#allocation2 + $0x34] ss:$8 sps:$4 sm:$0xff]   ;;  %v2767_v22 = vld [vmem:[#allocation2 + $0x30] ss:$8 sps:$4 sm:$0xff]  }
  0xa7   : > { %300 = vst.msk [vmem:[#allocation2 + $0x18] sm:$0xff] %vm2980_vm2, %v296_v15  ;;  %299 = vst.msk [vmem:[#allocation2 + $0x10] sm:$0xff] %vm2980_vm2, %v295_v16  ;;  %v401_v18 = vpop.permute.xlu1 %400  ;;  %v399_v19 = vpop.permute.xlu0 %398  ;;  %588 = vmatprep.subr.bf16.mxu0 %v2765_v17  ;;  %v2670_v15 = vld [vmem:[%s3754_s4 + $0x20] sm:$0xff] }
  0xa8   : > { %v407_v20 = vrot.slane %v401_v18, 4  ;;  %v406_v21 = vrot.slane %v399_v19, 4 }
  0xaa   : > { %v410_v23 = vsel %vm281_vm0, %v406_v21, %v407_v20  ;;  %589 = vmatpush1.bf16.msra.mxu0 %v2767_v22  ;;  %v2768_v24 = vld [vmem:[#allocation2 + $0x24] ss:$8 sps:$4 sm:$0xff]   ;;  %v2770_v30 = vld [vmem:[#allocation2 + $0x20] ss:$8 sps:$4 sm:$0xff]  }
  0xab   : > { %v412_v25 = vsel %vm411_vm11, %v399_v19, %v410_v23  ;;  %v405_v26 = vpop.permute.xlu1 %404  ;;  %v403_v27 = vpop.permute.xlu0 %402  ;;  %590 = vmatprep.subr.bf16.mxu0 %v2768_v24 }
  0xac   : > { %417 = vst.msk [vmem:[#allocation2 + $0x80] sm:$0xff] %vm2980_vm2, %v412_v25  ;;  %v409_v28 = vrot.slane %v405_v26, 4  ;;  %v408_v29 = vrot.slane %v403_v27, 4  ;;  %v930_v25 = vld [vmem:[%s3754_s4 + $0x18] sm:$0xff]  ;;  %v927_v26 = vld [vmem:[%s3754_s4] sm:$0xff] }
  0xae   : > { %v413_v31 = vsel %vm281_vm0, %v408_v29, %v409_v28  ;;  %591 = vmatpush1.bf16.msra.mxu0 %v2770_v30  ;;  %v2771_v32 = vld [vmem:[#allocation2 + $0x14] ss:$8 sps:$4 sm:$0xff]   ;;  %v2773_v35 = vld [vmem:[#allocation2 + $0x10] ss:$8 sps:$4 sm:$0xff]   ;;  %v928_v28 = vld [vmem:[%s3754_s4 + $0x8] sm:$0xff] }
  0xaf   : > { %v414_v33 = vsel %vm411_vm11, %v403_v27, %v413_v31  ;;  %592 = vmatprep.subr.bf16.mxu0 %v2771_v32  ;;  %v2837_v27 = vld [vmem:[%s3753_s3 + $0x4] ss:$12 sps:$4 sm:$0xff]  }
  0xb0   : > { %418 = vst.msk [vmem:[#allocation2 + $0x88] sm:$0xff] %vm2980_vm2, %v414_v33  ;;  %1200 = vmatprep.mubr.bf16.mxu1 %v2837_v27 }
  0xb2   : > { %593 = vmatpush1.bf16.msra.mxu0 %v2773_v35 }
  0xb3   : > { %594 = vmatprep.subr.bf16.mxu0 %v2774_v34 }
  0xb6   : > { %595 = vmatpush1.bf16.msra.mxu0 %v2776_v36 }
  0xb7   : > { %v2777_v37 = vld [vmem:[#allocation2 + $0x84] ss:$8 sps:$4 sm:$0xff]   ;;  %v2779_v38 = vld [vmem:[#allocation2 + $0x80] ss:$8 sps:$4 sm:$0xff]  }
  0xb8   : > { %610 = vmatprep.subr.bf16.mxu0 %v2777_v37  ;;  %v463_v42 = vpop.permute.xlu1 %462  ;;  %v458_v43 = vpop.permute.xlu0 %457 }
  0xba   : > { %611 = vmatpush2.bf16.msra.mxu0 %v2779_v38 }
  0xbc   : > { %v448_v44 = vpop.permute.xlu1 %447  ;;  %v453_v48 = vpop.permute.xlu0 %452 }
  0xbd   : > { %613 = vmatmul.mubr.bf16.vlgmr.msra.gmra.mxu0 %v2780_v39 }
  0xbe   : > { %2609 = vmatprep.mubr.msk.bf16.mxu0 %vm573_vm3, %v2783_v40 }
  0xc5   : > { %623 = vmatmul.mubr.bf16.gmra.mxu0 %v2785_v41 }
 0x17d   : > { %v614_v45 = vpop.f32.mrf.mxu0 }
 0x17e   : > { %v615_v46 = vadd.f32 %v614_v45, %v448_v44 }
 0x17f   : > { %v616_v47 = vpop.f32.mrf.mxu0 }
 0x180   : > { %v633_v49 = vmul.f32 0.2, %v615_v46  ;;  %v617_v50 = vadd.f32 %v616_v47, %v448_v44 }
 0x181   : > { %v618_v51 = vpop.f32.mrf.mxu0 }
 0x182   : > { %v634_v52 = vmul.f32 0.2, %v617_v50  ;;  %v619_v53 = vadd.f32 %v618_v51, %v453_v48  ;;  %v641_v55 = vmax.f32 %v615_v46, %v633_v49 }
 0x183   : > { %v620_v54 = vpop.f32.mrf.mxu0 }
 0x184   : > { %v642_v56 = vmax.f32 %v617_v50, %v634_v52  ;;  %v635_v57 = vmul.f32 0.2, %v619_v53  ;;  %v621_v58 = vadd.f32 %v620_v54, %v453_v48 }
 0x185   : > { %v624_v59 = vpop.f32.mrf.mxu0 }
 0x186   : > { %v2724_v60 = vpack.c.bf16 %v642_v56, %v641_v55  ;;  %v636_v61 = vmul.f32 0.2, %v621_v58  ;;  %v625_v62 = vadd.f32 %v624_v59, %v458_v43  ;;  %v643_v1 = vmax.f32 %v619_v53, %v635_v57 }
 0x187   : > { %v626_v63 = vpop.f32.mrf.mxu0 }
 0x188   : > { %673 = vst.msk [vmem:[#allocation3] sm:$0xff] %vm2980_vm2, %v2724_v60  ;;  %v644_v2 = vmax.f32 %v621_v58, %v636_v61  ;;  %v637_v3 = vmul.f32 0.2, %v625_v62  ;;  %v627_v4 = vadd.f32 %v626_v63, %v458_v43 }
 0x189   : > { %v628_v5 = vpop.f32.mrf.mxu0 }
 0x18a   : > { %v2725_v6 = vpack.c.bf16 %v644_v2, %v643_v1  ;;  %v638_v7 = vmul.f32 0.2, %v627_v4  ;;  %v629_v9 = vadd.f32 %v628_v5, %v463_v42  ;;  %v645_v11 = vmax.f32 %v625_v62, %v637_v3 }
 0x18b   : > { %v630_v10 = vpop.f32.mrf.mxu0 }
 0x18c   : > { %674 = vst.msk [vmem:[#allocation3 + $0x8] sm:$0xff] %vm2980_vm2, %v2725_v6  ;;  %v646_v12 = vmax.f32 %v627_v4, %v638_v7  ;;  %v639_v13 = vmul.f32 0.2, %v629_v9  ;;  %v631_v14 = vadd.f32 %v630_v10, %v463_v42 }
 0x18e   : > { %v2726_v16 = vpack.c.bf16 %v646_v12, %v645_v11  ;;  %v640_v17 = vmul.f32 0.2, %v631_v14  ;;  %v647_v19 = vmax.f32 %v629_v9, %v639_v13 }
 0x18f   : > { %v677_v18 = vld [vmem:[#allocation3] sm:$0xff] }
 0x190   : > { %675 = vst.msk [vmem:[#allocation3 + $0x10] sm:$0xff] %vm2980_vm2, %v2726_v16  ;;  %v648_v20 = vmax.f32 %v631_v14, %v640_v17 }
 0x191   : > { %683 = vst.msk [vmem:[#allocation2] sm:$0xff] %vm3100_vm13, %v677_v18 }
 0x192   : > { %v2727_v21 = vpack.c.bf16 %v648_v20, %v647_v19 }
 0x193   : > { %v678_v22 = vld [vmem:[#allocation3 + $0x8] sm:$0xff] }
 0x194   : > { %676 = vst.msk [vmem:[#allocation3 + $0x18] sm:$0xff] %vm2980_vm2, %v2727_v21 }
 0x195   : > { %684 = vst.msk [vmem:[#allocation2 + $0x8] sm:$0xff] %vm3100_vm13, %v678_v22 }
 0x197   : > { %v679_v23 = vld [vmem:[#allocation3 + $0x10] sm:$0xff] }
 0x198   : > { %743 = vrot.lane.b32.xlu1 %v679_v23, %s2920_s12  ;;  %685 = vst.msk [vmem:[#allocation2 + $0x10] sm:$0xff] %vm3100_vm13, %v679_v23 }
 0x19b   : > { %v680_v24 = vld [vmem:[#allocation3 + $0x18] sm:$0xff] }
 0x19c   : > { %745 = vrot.lane.b32.xlu0 %v680_v24, %s2920_s12  ;;  %686 = vst.msk [vmem:[#allocation2 + $0x18] sm:$0xff] %vm3100_vm13, %v680_v24  ;;  %739 = vrot.lane.b32.xlu1 %v677_v18, %s2920_s12 }
 0x1a0   : > { %741 = vrot.lane.b32.xlu0 %v678_v22, %s2920_s12  ;;  %719 = vrot.lane.b32.xlu1 %v679_v23, %s2921_s13 }
 0x1a4   : > { %721 = vrot.lane.b32.xlu0 %v680_v24, %s2921_s13  ;;  %715 = vrot.lane.b32.xlu1 %v677_v18, %s2921_s13 }
 0x1a8   : > { %717 = vrot.lane.b32.xlu0 %v678_v22, %s2921_s13  ;;  %695 = vrot.lane.b32.xlu1 %v679_v23, %s2922_s14 }
 0x1ac   : > { %697 = vrot.lane.b32.xlu0 %v680_v24, %s2922_s14  ;;  %691 = vrot.lane.b32.xlu1 %v677_v18, %s2922_s14 }
 0x1b0   : > { %693 = vrot.lane.b32.xlu0 %v678_v22, %s2922_s14  ;;  %839 = vrot.lane.b32.xlu1 %v679_v23, %s2916_s8 }
 0x1b4   : > { %841 = vrot.lane.b32.xlu0 %v680_v24, %s2916_s8  ;;  %835 = vrot.lane.b32.xlu1 %v677_v18, %s2916_s8 }
 0x1b8   : > { %837 = vrot.lane.b32.xlu0 %v678_v22, %s2916_s8  ;;  %815 = vrot.lane.b32.xlu1 %v679_v23, %s2917_s9 }
 0x1bc   : > { %817 = vrot.lane.b32.xlu0 %v680_v24, %s2917_s9  ;;  %811 = vrot.lane.b32.xlu1 %v677_v18, %s2917_s9 }
 0x1c0   : > { %813 = vrot.lane.b32.xlu0 %v678_v22, %s2917_s9  ;;  %791 = vrot.lane.b32.xlu1 %v679_v23, %s2918_s10 }
 0x1c4   : > { %793 = vrot.lane.b32.xlu0 %v680_v24, %s2918_s10  ;;  %787 = vrot.lane.b32.xlu1 %v677_v18, %s2918_s10 }
 0x1c8   : > { %789 = vrot.lane.b32.xlu0 %v678_v22, %s2918_s10  ;;  %767 = vrot.lane.b32.xlu1 %v679_v23, %s2919_s11 }
 0x1cc   : > { %769 = vrot.lane.b32.xlu0 %v680_v24, %s2919_s11  ;;  %763 = vrot.lane.b32.xlu1 %v677_v18, %s2919_s11 }
 0x1d0   : > { %765 = vrot.lane.b32.xlu0 %v678_v22, %s2919_s11  ;;  %863 = vrot.lane.b32.xlu1 %v679_v23, %s2923_s15 }
 0x1d4   : > { %865 = vrot.lane.b32.xlu0 %v680_v24, %s2923_s15  ;;  %859 = vrot.lane.b32.xlu1 %v677_v18, %s2923_s15 }
 0x1d8   : > { %861 = vrot.lane.b32.xlu0 %v678_v22, %s2923_s15  ;;  %943 = vperm.xlu1 %2755, %v929_v0  }
 0x1dc   : > { %948 = vperm.xlu0 %2754, %v930_v25   ;;  %933 = vperm.xlu1 %2755, %v927_v26  }
 0x1e0   : > { %938 = vperm.xlu0 %2754, %v928_v28  }
 0x20a   : > { %v744_v29 = vpop.permute.xlu1 %743 }
 0x20b   : > { %v749_v30 = vrot.slane %v744_v29, 4 }
 0x20d   : > { %v753_v31 = vsel %vm320_vm8, %v744_v29, %v749_v30 }
 0x20e   : > { %761 = vst.msk [vmem:[#allocation2 + $0x70] sm:$0xff] %vm3100_vm13, %v753_v31  ;;  %v746_v32 = vpop.permute.xlu0 %745  ;;  %v740_v33 = vpop.permute.xlu1 %739 }
 0x20f   : > { %v750_v34 = vrot.slane %v746_v32, 4  ;;  %v747_v35 = vrot.slane %v740_v33, 4 }
 0x211   : > { %v754_v36 = vsel %vm320_vm8, %v746_v32, %v750_v34  ;;  %v751_v37 = vsel %vm320_vm8, %v740_v33, %v747_v35  ;;  %v886_v34 = vld [vmem:[#allocation2 + $0x18] sm:$0xff] }
 0x212   : > { %762 = vst.msk [vmem:[#allocation2 + $0x78] sm:$0xff] %vm3100_vm13, %v754_v36  ;;  %759 = vst.msk [vmem:[#allocation2 + $0x60] sm:$0xff] %vm3100_vm13, %v751_v37  ;;  %v742_v38 = vpop.permute.xlu0 %741  ;;  %v720_v39 = vpop.permute.xlu1 %719  ;;  %v2804_v35 = vld [vmem:[#allocation2 + $0x14] ss:$8 sps:$4 sm:$0xff]  }
 0x213   : > { %v748_v40 = vrot.slane %v742_v38, 4  ;;  %v725_v41 = vrot.slane %v720_v39, 4 }
 0x215   : > { %v752_v42 = vsel %vm320_vm8, %v742_v38, %v748_v40  ;;  %v729_v43 = vsel %vm307_vm9, %v720_v39, %v725_v41  ;;  %v885_v38 = vld [vmem:[#allocation2 + $0x10] sm:$0xff] }
 0x216   : > { %760 = vst.msk [vmem:[#allocation2 + $0x68] sm:$0xff] %vm3100_vm13, %v752_v42  ;;  %737 = vst.msk [vmem:[#allocation2 + $0x50] sm:$0xff] %vm3100_vm13, %v729_v43  ;;  %v722_v44 = vpop.permute.xlu0 %721  ;;  %v716_v45 = vpop.permute.xlu1 %715  ;;  %v2622_v41 = vcombine.low %v885_v38, %v886_v34 }
 0x217   : > { %v726_v46 = vrot.slane %v722_v44, 4  ;;  %v723_v47 = vrot.slane %v716_v45, 4 }
 0x219   : > { %v730_v48 = vsel %vm307_vm9, %v722_v44, %v726_v46  ;;  %v727_v49 = vsel %vm307_vm9, %v716_v45, %v723_v47  ;;  %v2786_v50 = vld [vmem:[#allocation2 + $0x74] ss:$8 sps:$4 sm:$0xff]   ;;  %v2788_v51 = vld [vmem:[#allocation2 + $0x70] ss:$8 sps:$4 sm:$0xff]   ;;  %v2806_v44 = vld [vmem:[#allocation2 + $0x4] ss:$8 sps:$4 sm:$0xff]  }
 0x21a   : > { %738 = vst.msk [vmem:[#allocation2 + $0x58] sm:$0xff] %vm3100_vm13, %v730_v48  ;;  %735 = vst.msk [vmem:[#allocation2 + $0x40] sm:$0xff] %vm3100_vm13, %v727_v49  ;;  %v718_v52 = vpop.permute.xlu0 %717  ;;  %v696_v53 = vpop.permute.xlu1 %695  ;;  %1168 = vmatprep.subr.bf16.mxu1 %v2786_v50  ;;  %v2808_v49 = vld [vmem:[#allocation2] ss:$8 sps:$4 sm:$0xff]  }
 0x21b   : > { %v724_v54 = vrot.slane %v718_v52, 4  ;;  %v701_v55 = vrot.slane %v696_v53, 4  ;;  %1169 = vmatpush1.bf16.msra.mxu1 %v2788_v51 }
 0x21d   : > { %v728_v56 = vsel %vm307_vm9, %v718_v52, %v724_v54  ;;  %v705_v57 = vsel %vm294_vm10, %v696_v53, %v701_v55  ;;  %v2789_v58 = vld [vmem:[#allocation2 + $0x64] ss:$8 sps:$4 sm:$0xff]   ;;  %v2791_v59 = vld [vmem:[#allocation2 + $0x60] ss:$8 sps:$4 sm:$0xff]  }
 0x21e   : > { %736 = vst.msk [vmem:[#allocation2 + $0x48] sm:$0xff] %vm3100_vm13, %v728_v56  ;;  %713 = vst.msk [vmem:[#allocation2 + $0x30] sm:$0xff] %vm3100_vm13, %v705_v57  ;;  %v698_v60 = vpop.permute.xlu0 %697  ;;  %v692_v61 = vpop.permute.xlu1 %691  ;;  %1170 = vmatprep.subr.bf16.mxu1 %v2789_v58 }
 0x21f   : > { %v702_v62 = vrot.slane %v698_v60, 4  ;;  %v699_v63 = vrot.slane %v692_v61, 4  ;;  %1171 = vmatpush1.bf16.msra.mxu1 %v2791_v59 }
 0x221   : > { %v706_v1 = vsel %vm294_vm10, %v698_v60, %v702_v62  ;;  %v703_v2 = vsel %vm294_vm10, %v692_v61, %v699_v63  ;;  %v2792_v3 = vld [vmem:[#allocation2 + $0x54] ss:$8 sps:$4 sm:$0xff]   ;;  %v2794_v4 = vld [vmem:[#allocation2 + $0x50] ss:$8 sps:$4 sm:$0xff]  }
 0x222   : > { %714 = vst.msk [vmem:[#allocation2 + $0x38] sm:$0xff] %vm3100_vm13, %v706_v1  ;;  %711 = vst.msk [vmem:[#allocation2 + $0x20] sm:$0xff] %vm3100_vm13, %v703_v2  ;;  %v694_v5 = vpop.permute.xlu0 %693  ;;  %v840_v6 = vpop.permute.xlu1 %839  ;;  %1172 = vmatprep.subr.bf16.mxu1 %v2792_v3 }
 0x223   : > { %v700_v7 = vrot.slane %v694_v5, 4  ;;  %v845_v9 = vrot.slane %v840_v6, 4  ;;  %1173 = vmatpush1.bf16.msra.mxu1 %v2794_v4 }
 0x225   : > { %v704_v10 = vsel %vm294_vm10, %v694_v5, %v700_v7  ;;  %v849_v11 = vsel %vm390_vm4, %v840_v6, %v845_v9  ;;  %v2795_v12 = vld [vmem:[#allocation2 + $0x44] ss:$8 sps:$4 sm:$0xff]   ;;  %v2797_v13 = vld [vmem:[#allocation2 + $0x40] ss:$8 sps:$4 sm:$0xff]  }
 0x226   : > { %712 = vst.msk [vmem:[#allocation2 + $0x28] sm:$0xff] %vm3100_vm13, %v704_v10  ;;  %857 = vst.msk [vmem:[#allocation2 + $0xf0] sm:$0xff] %vm3100_vm13, %v849_v11  ;;  %v842_v14 = vpop.permute.xlu0 %841  ;;  %v836_v16 = vpop.permute.xlu1 %835  ;;  %1174 = vmatprep.subr.bf16.mxu1 %v2795_v12 }
 0x227   : > { %v846_v17 = vrot.slane %v842_v14, 4  ;;  %v843_v18 = vrot.slane %v836_v16, 4  ;;  %1175 = vmatpush1.bf16.msra.mxu1 %v2797_v13 }
 0x229   : > { %v850_v19 = vsel %vm390_vm4, %v842_v14, %v846_v17  ;;  %v847_v20 = vsel %vm390_vm4, %v836_v16, %v843_v18  ;;  %v2798_v21 = vld [vmem:[#allocation2 + $0x34] ss:$8 sps:$4 sm:$0xff]   ;;  %v2800_v22 = vld [vmem:[#allocation2 + $0x30] ss:$8 sps:$4 sm:$0xff]  }
 0x22a   : > { %858 = vst.msk [vmem:[#allocation2 + $0xf8] sm:$0xff] %vm3100_vm13, %v850_v19  ;;  %855 = vst.msk [vmem:[#allocation2 + $0xe0] sm:$0xff] %vm3100_vm13, %v847_v20  ;;  %v838_v23 = vpop.permute.xlu0 %837  ;;  %v816_v24 = vpop.permute.xlu1 %815  ;;  %1176 = vmatprep.subr.bf16.mxu1 %v2798_v21 }
 0x22b   : > { %v844_v0 = vrot.slane %v838_v23, 4  ;;  %v821_v25 = vrot.slane %v816_v24, 4  ;;  %1177 = vmatpush1.bf16.msra.mxu1 %v2800_v22 }
 0x22d   : > { %v848_v26 = vsel %vm390_vm4, %v838_v23, %v844_v0  ;;  %v825_v27 = vsel %vm369_vm5, %v816_v24, %v821_v25  ;;  %v2801_v28 = vld [vmem:[#allocation2 + $0x24] ss:$8 sps:$4 sm:$0xff]   ;;  %v2803_v29 = vld [vmem:[#allocation2 + $0x20] ss:$8 sps:$4 sm:$0xff]  }
 0x22e   : > { %856 = vst.msk [vmem:[#allocation2 + $0xe8] sm:$0xff] %vm3100_vm13, %v848_v26  ;;  %833 = vst.msk [vmem:[#allocation2 + $0xd0] sm:$0xff] %vm3100_vm13, %v825_v27  ;;  %v818_v30 = vpop.permute.xlu0 %817  ;;  %v812_v31 = vpop.permute.xlu1 %811  ;;  %1178 = vmatprep.subr.bf16.mxu1 %v2801_v28 }
 0x22f   : > { %v822_v32 = vrot.slane %v818_v30, 4  ;;  %v819_v33 = vrot.slane %v812_v31, 4  ;;  %1179 = vmatpush1.bf16.msra.mxu1 %v2803_v29 }
 0x230   : > { %1180 = vmatprep.subr.bf16.mxu1 %v2804_v35 }
 0x231   : > { %v826_v36 = vsel %vm369_vm5, %v818_v30, %v822_v32  ;;  %v823_v37 = vsel %vm369_vm5, %v812_v31, %v819_v33  ;;  %v2809_v52 = vld [vmem:[#allocation2 + $0xf4] ss:$8 sps:$4 sm:$0xff]   ;;  %v2811_v57 = vld [vmem:[#allocation2 + $0xf0] ss:$8 sps:$4 sm:$0xff]  }
 0x232   : > { %834 = vst.msk [vmem:[#allocation2 + $0xd8] sm:$0xff] %vm3100_vm13, %v826_v36  ;;  %831 = vst.msk [vmem:[#allocation2 + $0xc0] sm:$0xff] %vm3100_vm13, %v823_v37  ;;  %v814_v39 = vpop.permute.xlu0 %813  ;;  %v792_v40 = vpop.permute.xlu1 %791  ;;  %v2835_v36 = vld [vmem:[%s3753_s3] ss:$12 sps:$4 sm:$0xff]   ;;  %v2842_v37 = vld [vmem:[%s3753_s3 + $0x1c] ss:$12 sps:$4 sm:$0xff]  }
 0x233   : > { %v820_v42 = vrot.slane %v814_v39, 4  ;;  %v797_v43 = vrot.slane %v792_v40, 4  ;;  %1181 = vmatpush1.bf16.msra.mxu1 %v2622_v41  ;;  %v2844_v41 = vld [vmem:[%s3753_s3 + $0x18] ss:$12 sps:$4 sm:$0xff]  }
 0x234   : > { %1182 = vmatprep.subr.bf16.mxu1 %v2806_v44 }
 0x235   : > { %v824_v45 = vsel %vm369_vm5, %v814_v39, %v820_v42  ;;  %v801_v46 = vsel %vm346_vm6, %v792_v40, %v797_v43  ;;  %v2812_v60 = vld [vmem:[#allocation2 + $0xe4] ss:$8 sps:$4 sm:$0xff]   ;;  %v2814_v2 = vld [vmem:[#allocation2 + $0xe0] ss:$8 sps:$4 sm:$0xff]  }
 0x236   : > { %832 = vst.msk [vmem:[#allocation2 + $0xc8] sm:$0xff] %vm3100_vm13, %v824_v45  ;;  %809 = vst.msk [vmem:[#allocation2 + $0xb0] sm:$0xff] %vm3100_vm13, %v801_v46  ;;  %v794_v47 = vpop.permute.xlu0 %793  ;;  %v788_v48 = vpop.permute.xlu1 %787  ;;  %v2845_v42 = vld [vmem:[%s3753_s3 + $0x8] ss:$12 sps:$4 sm:$0xff]   ;;  %v2846_v43 = vld [vmem:[%s3753_s3 + $0x20] ss:$12 sps:$4 sm:$0xff]  }
 0x237   : > { %v798_v50 = vrot.slane %v794_v47, 4  ;;  %v795_v51 = vrot.slane %v788_v48, 4  ;;  %1183 = vmatpush1.bf16.msra.mxu1 %v2808_v49 }
 0x238   : > { %1184 = vmatprep.subr.bf16.mxu1 %v2809_v52 }
 0x239   : > { %v802_v53 = vsel %vm346_vm6, %v794_v47, %v798_v50  ;;  %v799_v54 = vsel %vm346_vm6, %v788_v48, %v795_v51  ;;  %v2815_v5 = vld [vmem:[#allocation2 + $0xd4] ss:$8 sps:$4 sm:$0xff]   ;;  %v2817_v11 = vld [vmem:[#allocation2 + $0xd0] ss:$8 sps:$4 sm:$0xff]  }
 0x23a   : > { %810 = vst.msk [vmem:[#allocation2 + $0xb8] sm:$0xff] %vm3100_vm13, %v802_v53  ;;  %807 = vst.msk [vmem:[#allocation2 + $0xa0] sm:$0xff] %vm3100_vm13, %v799_v54  ;;  %v790_v55 = vpop.permute.xlu0 %789  ;;  %v768_v56 = vpop.permute.xlu1 %767 }
 0x23b   : > { %v796_v58 = vrot.slane %v790_v55, 4  ;;  %v773_v59 = vrot.slane %v768_v56, 4  ;;  %1185 = vmatpush2.bf16.msra.mxu1 %v2811_v57 }
 0x23c   : > { %1186 = vmatprep.subr.bf16.mxu1 %v2812_v60 }
 0x23d   : > { %v800_v61 = vsel %vm346_vm6, %v790_v55, %v796_v58  ;;  %v777_v62 = vsel %vm333_vm7, %v768_v56, %v773_v59  ;;  %v2818_v14 = vld [vmem:[#allocation2 + $0xc4] ss:$8 sps:$4 sm:$0xff]   ;;  %v2820_v20 = vld [vmem:[#allocation2 + $0xc0] ss:$8 sps:$4 sm:$0xff]  }
 0x23e   : > { %808 = vst.msk [vmem:[#allocation2 + $0xa8] sm:$0xff] %vm3100_vm13, %v800_v61  ;;  %785 = vst.msk [vmem:[#allocation2 + $0x90] sm:$0xff] %vm3100_vm13, %v777_v62  ;;  %v770_v63 = vpop.permute.xlu0 %769  ;;  %v764_v1 = vpop.permute.xlu1 %763 }
 0x23f   : > { %v774_v3 = vrot.slane %v770_v63, 4  ;;  %v771_v4 = vrot.slane %v764_v1, 4  ;;  %1187 = vmatpush2.bf16.msra.mxu1 %v2814_v2 }
 0x240   : > { %1188 = vmatprep.subr.bf16.mxu1 %v2815_v5 }
 0x241   : > { %v778_v6 = vsel %vm333_vm7, %v770_v63, %v774_v3  ;;  %v775_v7 = vsel %vm333_vm7, %v764_v1, %v771_v4  ;;  %v2821_v23 = vld [vmem:[#allocation2 + $0xb4] ss:$8 sps:$4 sm:$0xff]   ;;  %v2823_v26 = vld [vmem:[#allocation2 + $0xb0] ss:$8 sps:$4 sm:$0xff]  }
 0x242   : > { %786 = vst.msk [vmem:[#allocation2 + $0x98] sm:$0xff] %vm3100_vm13, %v778_v6  ;;  %783 = vst.msk [vmem:[#allocation2 + $0x80] sm:$0xff] %vm3100_vm13, %v775_v7  ;;  %v766_v9 = vpop.permute.xlu0 %765  ;;  %v864_v10 = vpop.permute.xlu1 %863 }
 0x243   : > { %v772_v12 = vrot.slane %v766_v9, 4  ;;  %v869_v13 = vrot.slane %v864_v10, 4  ;;  %1189 = vmatpush2.bf16.msra.mxu1 %v2817_v11 }
 0x244   : > { %1190 = vmatprep.subr.bf16.mxu1 %v2818_v14 }
 0x245   : > { %v776_v16 = vsel %vm333_vm7, %v766_v9, %v772_v12  ;;  %v873_v17 = vsel %vm411_vm11, %v864_v10, %v869_v13  ;;  %v2824_v28 = vld [vmem:[#allocation2 + $0xa4] ss:$8 sps:$4 sm:$0xff]   ;;  %v2826_v30 = vld [vmem:[#allocation2 + $0xa0] ss:$8 sps:$4 sm:$0xff]  }
 0x246   : > { %784 = vst.msk [vmem:[#allocation2 + $0x88] sm:$0xff] %vm3100_vm13, %v776_v16  ;;  %881 = vst.msk [vmem:[#allocation2 + $0x110] sm:$0xff] %vm3100_vm13, %v873_v17  ;;  %v866_v18 = vpop.permute.xlu0 %865  ;;  %v860_v19 = vpop.permute.xlu1 %859 }
 0x247   : > { %v870_v21 = vrot.slane %v866_v18, 4  ;;  %v867_v22 = vrot.slane %v860_v19, 4  ;;  %1191 = vmatpush2.bf16.msra.mxu1 %v2820_v20 }
 0x248   : > { %1192 = vmatprep.subr.bf16.mxu1 %v2821_v23 }
 0x249   : > { %v874_v24 = vsel %vm411_vm11, %v866_v18, %v870_v21  ;;  %v871_v0 = vsel %vm411_vm11, %v860_v19, %v867_v22  ;;  %v2827_v31 = vld [vmem:[#allocation2 + $0x94] ss:$8 sps:$4 sm:$0xff]   ;;  %v2829_v32 = vld [vmem:[#allocation2 + $0x90] ss:$8 sps:$4 sm:$0xff]  }
 0x24a   : > { %882 = vst.msk [vmem:[#allocation2 + $0x118] sm:$0xff] %vm3100_vm13, %v874_v24  ;;  %879 = vst.msk [vmem:[#allocation2 + $0x100] sm:$0xff] %vm3100_vm13, %v871_v0  ;;  %v862_v25 = vpop.permute.xlu0 %861 }
 0x24b   : > { %v868_v27 = vrot.slane %v862_v25, 4  ;;  %1193 = vmatpush2.bf16.msra.mxu1 %v2823_v26 }
 0x24c   : > { %1194 = vmatprep.subr.bf16.mxu1 %v2824_v28 }
 0x24d   : > { %v872_v29 = vsel %vm411_vm11, %v862_v25, %v868_v27  ;;  %v2830_v33 = vld [vmem:[#allocation2 + $0x84] ss:$8 sps:$4 sm:$0xff]   ;;  %v2832_v34 = vld [vmem:[#allocation2 + $0x80] ss:$8 sps:$4 sm:$0xff]  }
 0x24e   : > { %880 = vst.msk [vmem:[#allocation2 + $0x108] sm:$0xff] %vm3100_vm13, %v872_v29 }
 0x24f   : > { %1195 = vmatpush2.bf16.msra.mxu1 %v2826_v30 }
 0x250   : > { %1196 = vmatprep.subr.bf16.mxu1 %v2827_v31 }
 0x251   : > { %v2833_v35 = vld [vmem:[#allocation2 + $0x114] ss:$8 sps:$4 sm:$0xff]   ;;  %v2838_v38 = vld [vmem:[#allocation2 + $0x110] ss:$8 sps:$4 sm:$0xff]  }
 0x253   : > { %1197 = vmatpush2.bf16.msra.mxu1 %v2829_v32  ;;  %v944_v48 = vpop.permute.xlu1 %943 }
 0x254   : > { %1198 = vmatprep.subr.bf16.mxu1 %v2830_v33  ;;  %v2254_v33 = vld [vmem:[%s3755_s5 + $0x90] sm:$0xff] }
 0x255   : > { %v2839_v39 = vld [vmem:[#allocation2 + $0x104] ss:$8 sps:$4 sm:$0xff]   ;;  %v2841_v40 = vld [vmem:[#allocation2 + $0x100] ss:$8 sps:$4 sm:$0xff]  }
 0x257   : > { %1199 = vmatpush2.bf16.msra.mxu1 %v2832_v34  ;;  %v949_v51 = vpop.permute.xlu0 %948  ;;  %v934_v53 = vpop.permute.xlu1 %933 }
 0x258   : > { %1233 = vmatprep.subr.bf16.mxu1 %v2833_v35 }
 0x25a   : > { %1201 = vmatmul.mubr.bf16.vlgmr.msra.gmra.mxu1 %v2835_v36 }
 0x25b   : > { %1234 = vmatpush1.bf16.msra.mxu1 %v2838_v38  ;;  %1210 = vmatprep.mubr.bf16.mxu1 %v2842_v37  ;;  %v939_v59 = vpop.permute.xlu0 %938 }
 0x25c   : > { %1235 = vmatprep.subr.bf16.mxu1 %v2839_v39 }
 0x25f   : > { %1236 = vmatpush1.bf16.msra.mxu1 %v2841_v40 }
 0x262   : > { %1211 = vmatmul.mubr.bf16.gmra.mxu1 %v2844_v41 }
 0x263   : > { %1253 = vmatprep.mubr.bf16.mxu1 %v2924_v8 }
 0x26a   : > { %2656 = vmatmul.mubr.msk.bf16.vlgmr.msra.gmra.mxu1 %vm1161_vm14, %v2845_v42 }
 0x26b   : > { %1263 = vmatprep.mubr.bf16.mxu1 %v2924_v8 }
 0x272   : > { %2657 = vmatmul.mubr.msk.bf16.gmra.mxu1 %vm1161_vm14, %v2846_v43  ;;  %v2902_v43 = vld [vmem:[%s3753_s3 + $0x34] ss:$12 sps:$4 sm:$0xff]  }
 0x273   : > { %1895 = vmatprep.mubr.bf16.mxu1 %v2924_v8  ;;  %1842 = vmatprep.mubr.bf16.mxu0 %v2902_v43 }
 0x31a   : > { %v1202_v44 = vpop.f32.mrf.mxu1 }
 0x31b   : > { %v1203_v55 = vadd.f32 %v1202_v44, %v934_v53  ;;  %v2671_v44 = vld [vmem:[%s3754_s4 + $0x28] sm:$0xff] }
 0x31c   : > { %v1204_v45 = vpop.f32.mrf.mxu1 }
 0x31d   : > { %v1205_v57 = vadd.f32 %v1204_v45, %v934_v53  ;;  %v2672_v45 = vld [vmem:[%s3754_s4 + $0x30] sm:$0xff] }
 0x31e   : > { %v1206_v46 = vpop.f32.mrf.mxu1  ;;  %v2242_v53 = vld [vmem:[%s3755_s5 + $0x30] sm:$0xff] }
 0x31f   : > { %v1207_v61 = vadd.f32 %v1206_v46, %v939_v59  ;;  %v2673_v46 = vld [vmem:[%s3754_s4 + $0x38] sm:$0xff] }
 0x320   : > { %v1208_v47 = vpop.f32.mrf.mxu1 }
 0x321   : > { %v1209_v2 = vadd.f32 %v1208_v47, %v939_v59  ;;  %v2236_v47 = vld [vmem:[%s3755_s5] sm:$0xff] }
 0x322   : > { %v1212_v49 = vpop.f32.mrf.mxu1  ;;  %v2248_v59 = vld [vmem:[%s3755_s5 + $0x60] sm:$0xff] }
 0x323   : > { %v1213_v5 = vadd.f32 %v1212_v49, %v944_v48  ;;  %v2238_v49 = vld [vmem:[%s3755_s5 + $0x10] sm:$0xff] }
 0x324   : > { %v1214_v50 = vpop.f32.mrf.mxu1 }
 0x325   : > { %v1215_v13 = vadd.f32 %v1214_v50, %v944_v48  ;;  %v2237_v48 = vld [vmem:[%s3755_s5 + $0x8] sm:$0xff]  ;;  %v2239_v50 = vld [vmem:[%s3755_s5 + $0x18] sm:$0xff] }
 0x326   : > { %v1216_v52 = vpop.f32.mrf.mxu1 }
 0x327   : > { %v1217_v18 = vadd.f32 %v1216_v52, %v949_v51  ;;  %v2241_v52 = vld [vmem:[%s3755_s5 + $0x28] sm:$0xff] }
 0x328   : > { %v1218_v54 = vpop.f32.mrf.mxu1 }
 0x329   : > { %v1219_v0 = vadd.f32 %v1218_v54, %v949_v51  ;;  %v2240_v51 = vld [vmem:[%s3755_s5 + $0x20] sm:$0xff]  ;;  %v2243_v54 = vld [vmem:[%s3755_s5 + $0x38] sm:$0xff] }
 0x32a   : > { %v1255_v56 = vpop.f32.mrf.mxu1 }
 0x32b   : > { %v1256_v58 = vadd.f32 %v1255_v56, %v1203_v55  ;;  %v2244_v55 = vld [vmem:[%s3755_s5 + $0x40] sm:$0xff]  ;;  %v2245_v56 = vld [vmem:[%s3755_s5 + $0x48] sm:$0xff] }
 0x32c   : > { %v1257_v60 = vpop.f32.mrf.mxu1 }
 0x32d   : > { %v1274_v62 = vmul.f32 0.2, %v1256_v58  ;;  %v1258_v63 = vadd.f32 %v1257_v60, %v1205_v57  ;;  %v2246_v57 = vld [vmem:[%s3755_s5 + $0x50] sm:$0xff]  ;;  %v2249_v60 = vld [vmem:[%s3755_s5 + $0x68] sm:$0xff] }
 0x32e   : > { %v1259_v1 = vpop.f32.mrf.mxu1 }
 0x32f   : > { %v1275_v3 = vmul.f32 0.2, %v1258_v63  ;;  %v1260_v4 = vadd.f32 %v1259_v1, %v1207_v61  ;;  %v1282_v7 = vmax.f32 %v1256_v58, %v1274_v62  ;;  %v2247_v58 = vld [vmem:[%s3755_s5 + $0x58] sm:$0xff]  ;;  %v2250_v61 = vld [vmem:[%s3755_s5 + $0x70] sm:$0xff]  ;;  %v2253_v1 = vld [vmem:[%s3755_s5 + $0x88] sm:$0xff] }
 0x330   : > { %v1261_v6 = vpop.f32.mrf.mxu1  ;;  %v2251_v62 = vld [vmem:[%s3755_s5 + $0x78] sm:$0xff] }
 0x331   : > { %v1283_v9 = vmax.f32 %v1258_v63, %v1275_v3  ;;  %v1276_v10 = vmul.f32 0.2, %v1260_v4  ;;  %v1262_v11 = vadd.f32 %v1261_v6, %v1209_v2  ;;  %v2252_v63 = vld [vmem:[%s3755_s5 + $0x80] sm:$0xff] }
 0x332   : > { %v1265_v12 = vpop.f32.mrf.mxu1 }
 0x333   : > { %v2728_v14 = vpack.c.bf16 %v1283_v9, %v1282_v7  ;;  %v1277_v16 = vmul.f32 0.2, %v1262_v11  ;;  %v1266_v17 = vadd.f32 %v1265_v12, %v1213_v5  ;;  %v1284_v20 = vmax.f32 %v1260_v4, %v1276_v10 }
 0x334   : > { %v1267_v19 = vpop.f32.mrf.mxu1 }
 0x335   : > { %1314 = vst.msk [vmem:[#allocation4] sm:$0xff] %vm3100_vm13, %v2728_v14  ;;  %v1285_v21 = vmax.f32 %v1262_v11, %v1277_v16  ;;  %v1278_v22 = vmul.f32 0.2, %v1266_v17  ;;  %v1268_v23 = vadd.f32 %v1267_v19, %v1215_v13 }
 0x336   : > { %v1269_v24 = vpop.f32.mrf.mxu1 }
 0x337   : > { %v2729_v25 = vpack.c.bf16 %v1285_v21, %v1284_v20  ;;  %v1279_v26 = vmul.f32 0.2, %v1268_v23  ;;  %v1270_v27 = vadd.f32 %v1269_v24, %v1217_v18  ;;  %v1286_v29 = vmax.f32 %v1266_v17, %v1278_v22 }
 0x338   : > { %v1271_v28 = vpop.f32.mrf.mxu1 }
 0x339   : > { %1315 = vst.msk [vmem:[#allocation4 + $0x8] sm:$0xff] %vm3100_vm13, %v2729_v25  ;;  %v1287_v30 = vmax.f32 %v1268_v23, %v1279_v26  ;;  %v1280_v31 = vmul.f32 0.2, %v1270_v27  ;;  %v1272_v32 = vadd.f32 %v1271_v28, %v1219_v0 }
 0x33b   : > { %v2730_v34 = vpack.c.bf16 %v1287_v30, %v1286_v29  ;;  %v1281_v35 = vmul.f32 0.2, %v1272_v32  ;;  %v1288_v37 = vmax.f32 %v1270_v27, %v1280_v31 }
 0x33c   : > { %v1318_v36 = vld [vmem:[#allocation4] sm:$0xff] }
 0x33d   : > { %1316 = vst.msk [vmem:[#allocation4 + $0x10] sm:$0xff] %vm3100_vm13, %v2730_v34  ;;  %v1289_v38 = vmax.f32 %v1272_v32, %v1281_v35 }
 0x33e   : > { %1324 = vst.msk [vmem:[#allocation2] sm:$0xff] %vm3284_vm1, %v1318_v36 }
 0x33f   : > { %v2731_v39 = vpack.c.bf16 %v1289_v38, %v1288_v37 }
 0x340   : > { %v1319_v40 = vld [vmem:[#allocation4 + $0x8] sm:$0xff] }
 0x341   : > { %1317 = vst.msk [vmem:[#allocation4 + $0x18] sm:$0xff] %vm3100_vm13, %v2731_v39 }
 0x342   : > { %1325 = vst.msk [vmem:[#allocation2 + $0x8] sm:$0xff] %vm3284_vm1, %v1319_v40 }
 0x344   : > { %v1320_v41 = vld [vmem:[#allocation4 + $0x10] sm:$0xff] }
 0x345   : > { %1384 = vrot.lane.b32.xlu1 %v1320_v41, %s2920_s12  ;;  %1326 = vst.msk [vmem:[#allocation2 + $0x10] sm:$0xff] %vm3284_vm1, %v1320_v41 }
 0x348   : > { %v1321_v42 = vld [vmem:[#allocation4 + $0x18] sm:$0xff] }
 0x349   : > { %1386 = vrot.lane.b32.xlu0 %v1321_v42, %s2920_s12  ;;  %1327 = vst.msk [vmem:[#allocation2 + $0x18] sm:$0xff] %vm3284_vm1, %v1321_v42  ;;  %1380 = vrot.lane.b32.xlu1 %v1318_v36, %s2920_s12 }
 0x34d   : > { %1382 = vrot.lane.b32.xlu0 %v1319_v40, %s2920_s12  ;;  %1360 = vrot.lane.b32.xlu1 %v1320_v41, %s2921_s13 }
 0x351   : > { %1362 = vrot.lane.b32.xlu0 %v1321_v42, %s2921_s13  ;;  %1356 = vrot.lane.b32.xlu1 %v1318_v36, %s2921_s13 }
 0x355   : > { %1358 = vrot.lane.b32.xlu0 %v1319_v40, %s2921_s13  ;;  %1336 = vrot.lane.b32.xlu1 %v1320_v41, %s2922_s14 }
 0x359   : > { %1338 = vrot.lane.b32.xlu0 %v1321_v42, %s2922_s14  ;;  %1332 = vrot.lane.b32.xlu1 %v1318_v36, %s2922_s14 }
 0x35d   : > { %1334 = vrot.lane.b32.xlu0 %v1319_v40, %s2922_s14  ;;  %1480 = vrot.lane.b32.xlu1 %v1320_v41, %s2916_s8 }
 0x361   : > { %1478 = vrot.lane.b32.xlu0 %v1319_v40, %s2916_s8  ;;  %1476 = vrot.lane.b32.xlu1 %v1318_v36, %s2916_s8 }
 0x365   : > { %1482 = vrot.lane.b32.xlu0 %v1321_v42, %s2916_s8  ;;  %1456 = vrot.lane.b32.xlu1 %v1320_v41, %s2917_s9 }
 0x369   : > { %1454 = vrot.lane.b32.xlu0 %v1319_v40, %s2917_s9  ;;  %1452 = vrot.lane.b32.xlu1 %v1318_v36, %s2917_s9 }
 0x36d   : > { %1458 = vrot.lane.b32.xlu0 %v1321_v42, %s2917_s9  ;;  %1432 = vrot.lane.b32.xlu1 %v1320_v41, %s2918_s10 }
 0x371   : > { %1430 = vrot.lane.b32.xlu0 %v1319_v40, %s2918_s10  ;;  %1428 = vrot.lane.b32.xlu1 %v1318_v36, %s2918_s10 }
 0x375   : > { %1434 = vrot.lane.b32.xlu0 %v1321_v42, %s2918_s10  ;;  %1408 = vrot.lane.b32.xlu1 %v1320_v41, %s2919_s11 }
 0x379   : > { %1406 = vrot.lane.b32.xlu0 %v1319_v40, %s2919_s11  ;;  %1504 = vrot.lane.b32.xlu1 %v1320_v41, %s2923_s15 }
 0x37d   : > { %1410 = vrot.lane.b32.xlu0 %v1321_v42, %s2919_s11  ;;  %1404 = vrot.lane.b32.xlu1 %v1318_v36, %s2919_s11 }
 0x381   : > { %1506 = vrot.lane.b32.xlu0 %v1321_v42, %s2923_s15  ;;  %1500 = vrot.lane.b32.xlu1 %v1318_v36, %s2923_s15 }
 0x385   : > { %1502 = vrot.lane.b32.xlu0 %v1319_v40, %s2923_s15  ;;  %1576 = vperm.xlu1 %2755, %v2670_v15  }
 0x389   : > { %1581 = vperm.xlu0 %2754, %v2671_v44   ;;  %1586 = vperm.xlu1 %2755, %v2672_v45  }
 0x38d   : > { %1591 = vperm.xlu0 %2754, %v2673_v46   ;;  %2274 = vperm.xlu1 %2755, %v2236_v47  }
 0x391   : > { %2279 = vperm.xlu0 %2754, %v2237_v48   ;;  %2284 = vperm.xlu1 %2755, %v2238_v49  }
 0x395   : > { %2289 = vperm.xlu0 %2754, %v2239_v50   ;;  %2294 = vperm.xlu1 %2755, %v2240_v51  }
 0x399   : > { %2299 = vperm.xlu0 %2754, %v2241_v52   ;;  %2304 = vperm.xlu1 %2755, %v2242_v53  }
 0x39d   : > { %2309 = vperm.xlu0 %2754, %v2243_v54   ;;  %2314 = vperm.xlu1 %2755, %v2244_v55  }
 0x3a1   : > { %2319 = vperm.xlu0 %2754, %v2245_v56   ;;  %2324 = vperm.xlu1 %2755, %v2246_v57  }
 0x3a5   : > { %2329 = vperm.xlu0 %2754, %v2247_v58   ;;  %2334 = vperm.xlu1 %2755, %v2248_v59  }
 0x3a9   : > { %2339 = vperm.xlu0 %2754, %v2249_v60   ;;  %2344 = vperm.xlu1 %2755, %v2250_v61  }
 0x3ad   : > { %2349 = vperm.xlu0 %2754, %v2251_v62   ;;  %2354 = vperm.xlu1 %2755, %v2252_v63  }
 0x3b1   : > { %2359 = vperm.xlu0 %2754, %v2253_v1  }
 0x3b7   : > { %v1385_v2 = vpop.permute.xlu1 %1384 }
 0x3b8   : > { %v1390_v3 = vrot.slane %v1385_v2, 4 }
 0x3ba   : > { %v1394_v4 = vsel %vm320_vm8, %v1385_v2, %v1390_v3 }
 0x3bb   : > { %1402 = vst.msk [vmem:[#allocation2 + $0x70] sm:$0xff] %vm3284_vm1, %v1394_v4  ;;  %v1387_v5 = vpop.permute.xlu0 %1386  ;;  %v1381_v6 = vpop.permute.xlu1 %1380 }
 0x3bc   : > { %v1391_v7 = vrot.slane %v1387_v5, 4  ;;  %v1388_v9 = vrot.slane %v1381_v6, 4 }
 0x3be   : > { %v1395_v10 = vsel %vm320_vm8, %v1387_v5, %v1391_v7  ;;  %v1392_v11 = vsel %vm320_vm8, %v1381_v6, %v1388_v9  ;;  %v1527_v7 = vld [vmem:[#allocation2 + $0x18] sm:$0xff] }
 0x3bf   : > { %1403 = vst.msk [vmem:[#allocation2 + $0x78] sm:$0xff] %vm3284_vm1, %v1395_v10  ;;  %1400 = vst.msk [vmem:[#allocation2 + $0x60] sm:$0xff] %vm3284_vm1, %v1392_v11  ;;  %v1383_v12 = vpop.permute.xlu0 %1382  ;;  %v1361_v13 = vpop.permute.xlu1 %1360  ;;  %v2865_v9 = vld [vmem:[#allocation2 + $0x14] ss:$8 sps:$4 sm:$0xff]  }
 0x3c0   : > { %v1389_v14 = vrot.slane %v1383_v12, 4  ;;  %v1366_v16 = vrot.slane %v1361_v13, 4 }
 0x3c2   : > { %v1393_v17 = vsel %vm320_vm8, %v1383_v12, %v1389_v14  ;;  %v1370_v18 = vsel %vm307_vm9, %v1361_v13, %v1366_v16  ;;  %v1526_v12 = vld [vmem:[#allocation2 + $0x10] sm:$0xff] }
 0x3c3   : > { %1401 = vst.msk [vmem:[#allocation2 + $0x68] sm:$0xff] %vm3284_vm1, %v1393_v17  ;;  %1378 = vst.msk [vmem:[#allocation2 + $0x50] sm:$0xff] %vm3284_vm1, %v1370_v18  ;;  %v1363_v19 = vpop.permute.xlu0 %1362  ;;  %v1357_v20 = vpop.permute.xlu1 %1356  ;;  %v2682_v16 = vcombine.low %v1526_v12, %v1527_v7 }
 0x3c4   : > { %v1367_v21 = vrot.slane %v1363_v19, 4  ;;  %v1364_v22 = vrot.slane %v1357_v20, 4 }
 0x3c6   : > { %v1371_v23 = vsel %vm307_vm9, %v1363_v19, %v1367_v21  ;;  %v1368_v24 = vsel %vm307_vm9, %v1357_v20, %v1364_v22  ;;  %v2847_v0 = vld [vmem:[#allocation2 + $0x74] ss:$8 sps:$4 sm:$0xff]   ;;  %v2849_v25 = vld [vmem:[#allocation2 + $0x70] ss:$8 sps:$4 sm:$0xff]   ;;  %v2867_v19 = vld [vmem:[#allocation2 + $0x4] ss:$8 sps:$4 sm:$0xff]  }
 0x3c7   : > { %1379 = vst.msk [vmem:[#allocation2 + $0x58] sm:$0xff] %vm3284_vm1, %v1371_v23  ;;  %1376 = vst.msk [vmem:[#allocation2 + $0x40] sm:$0xff] %vm3284_vm1, %v1368_v24  ;;  %v1359_v26 = vpop.permute.xlu0 %1358  ;;  %v1337_v27 = vpop.permute.xlu1 %1336  ;;  %1810 = vmatprep.subr.bf16.mxu0 %v2847_v0  ;;  %v2869_v24 = vld [vmem:[#allocation2] ss:$8 sps:$4 sm:$0xff]  }
 0x3c8   : > { %v1365_v28 = vrot.slane %v1359_v26, 4  ;;  %v1342_v29 = vrot.slane %v1337_v27, 4  ;;  %1811 = vmatpush1.bf16.msra.mxu0 %v2849_v25 }
 0x3ca   : > { %v1369_v30 = vsel %vm307_vm9, %v1359_v26, %v1365_v28  ;;  %v1346_v31 = vsel %vm294_vm10, %v1337_v27, %v1342_v29  ;;  %v2850_v32 = vld [vmem:[#allocation2 + $0x64] ss:$8 sps:$4 sm:$0xff]   ;;  %v2852_v34 = vld [vmem:[#allocation2 + $0x60] ss:$8 sps:$4 sm:$0xff]  }
 0x3cb   : > { %1377 = vst.msk [vmem:[#allocation2 + $0x48] sm:$0xff] %vm3284_vm1, %v1369_v30  ;;  %1354 = vst.msk [vmem:[#allocation2 + $0x30] sm:$0xff] %vm3284_vm1, %v1346_v31  ;;  %v1339_v35 = vpop.permute.xlu0 %1338  ;;  %v1333_v36 = vpop.permute.xlu1 %1332  ;;  %1812 = vmatprep.subr.bf16.mxu0 %v2850_v32 }
 0x3cc   : > { %v1343_v37 = vrot.slane %v1339_v35, 4  ;;  %v1340_v38 = vrot.slane %v1333_v36, 4  ;;  %1813 = vmatpush1.bf16.msra.mxu0 %v2852_v34 }
 0x3ce   : > { %v1347_v39 = vsel %vm294_vm10, %v1339_v35, %v1343_v37  ;;  %v1344_v40 = vsel %vm294_vm10, %v1333_v36, %v1340_v38  ;;  %v2853_v41 = vld [vmem:[#allocation2 + $0x54] ss:$8 sps:$4 sm:$0xff]   ;;  %v2855_v42 = vld [vmem:[#allocation2 + $0x50] ss:$8 sps:$4 sm:$0xff]  }
 0x3cf   : > { %1355 = vst.msk [vmem:[#allocation2 + $0x38] sm:$0xff] %vm3284_vm1, %v1347_v39  ;;  %1352 = vst.msk [vmem:[#allocation2 + $0x20] sm:$0xff] %vm3284_vm1, %v1344_v40  ;;  %v1335_v15 = vpop.permute.xlu0 %1334  ;;  %v1481_v43 = vpop.permute.xlu1 %1480  ;;  %1814 = vmatprep.subr.bf16.mxu0 %v2853_v41 }
 0x3d0   : > { %v1341_v44 = vrot.slane %v1335_v15, 4  ;;  %v1486_v45 = vrot.slane %v1481_v43, 4  ;;  %1815 = vmatpush1.bf16.msra.mxu0 %v2855_v42 }
 0x3d2   : > { %v1345_v46 = vsel %vm294_vm10, %v1335_v15, %v1341_v44  ;;  %v1490_v47 = vsel %vm390_vm4, %v1481_v43, %v1486_v45  ;;  %v2856_v48 = vld [vmem:[#allocation2 + $0x44] ss:$8 sps:$4 sm:$0xff]   ;;  %v2858_v49 = vld [vmem:[#allocation2 + $0x40] ss:$8 sps:$4 sm:$0xff]  }
 0x3d3   : > { %1353 = vst.msk [vmem:[#allocation2 + $0x28] sm:$0xff] %vm3284_vm1, %v1345_v46  ;;  %1498 = vst.msk [vmem:[#allocation2 + $0xf0] sm:$0xff] %vm3284_vm1, %v1490_v47  ;;  %v1479_v50 = vpop.permute.xlu0 %1478  ;;  %v1477_v51 = vpop.permute.xlu1 %1476  ;;  %1816 = vmatprep.subr.bf16.mxu0 %v2856_v48 }
 0x3d4   : > { %v1485_v52 = vrot.slane %v1479_v50, 4  ;;  %v1484_v53 = vrot.slane %v1477_v51, 4  ;;  %1817 = vmatpush1.bf16.msra.mxu0 %v2858_v49 }
 0x3d6   : > { %v1489_v54 = vsel %vm390_vm4, %v1479_v50, %v1485_v52  ;;  %v1488_v55 = vsel %vm390_vm4, %v1477_v51, %v1484_v53  ;;  %v2859_v56 = vld [vmem:[#allocation2 + $0x34] ss:$8 sps:$4 sm:$0xff]   ;;  %v2861_v57 = vld [vmem:[#allocation2 + $0x30] ss:$8 sps:$4 sm:$0xff]  }
 0x3d7   : > { %1497 = vst.msk [vmem:[#allocation2 + $0xe8] sm:$0xff] %vm3284_vm1, %v1489_v54  ;;  %1496 = vst.msk [vmem:[#allocation2 + $0xe0] sm:$0xff] %vm3284_vm1, %v1488_v55  ;;  %v1483_v58 = vpop.permute.xlu0 %1482  ;;  %v1457_v59 = vpop.permute.xlu1 %1456  ;;  %1818 = vmatprep.subr.bf16.mxu0 %v2859_v56 }
 0x3d8   : > { %v1487_v60 = vrot.slane %v1483_v58, 4  ;;  %v1462_v61 = vrot.slane %v1457_v59, 4  ;;  %1819 = vmatpush1.bf16.msra.mxu0 %v2861_v57 }
 0x3da   : > { %v1491_v62 = vsel %vm390_vm4, %v1483_v58, %v1487_v60  ;;  %v1466_v63 = vsel %vm369_vm5, %v1457_v59, %v1462_v61  ;;  %v2862_v1 = vld [vmem:[#allocation2 + $0x24] ss:$8 sps:$4 sm:$0xff]   ;;  %v2864_v2 = vld [vmem:[#allocation2 + $0x20] ss:$8 sps:$4 sm:$0xff]  }
 0x3db   : > { %1499 = vst.msk [vmem:[#allocation2 + $0xf8] sm:$0xff] %vm3284_vm1, %v1491_v62  ;;  %1474 = vst.msk [vmem:[#allocation2 + $0xd0] sm:$0xff] %vm3284_vm1, %v1466_v63  ;;  %v1455_v3 = vpop.permute.xlu0 %1454  ;;  %v1453_v4 = vpop.permute.xlu1 %1452  ;;  %1820 = vmatprep.subr.bf16.mxu0 %v2862_v1 }
 0x3dc   : > { %v1461_v5 = vrot.slane %v1455_v3, 4  ;;  %v1460_v6 = vrot.slane %v1453_v4, 4  ;;  %1821 = vmatpush1.bf16.msra.mxu0 %v2864_v2 }
 0x3dd   : > { %1822 = vmatprep.subr.bf16.mxu0 %v2865_v9 }
 0x3de   : > { %v1465_v10 = vsel %vm369_vm5, %v1455_v3, %v1461_v5  ;;  %v1464_v11 = vsel %vm369_vm5, %v1453_v4, %v1460_v6  ;;  %v2873_v35 = vld [vmem:[#allocation2 + $0xe4] ss:$8 sps:$4 sm:$0xff]   ;;  %v2875_v40 = vld [vmem:[#allocation2 + $0xe0] ss:$8 sps:$4 sm:$0xff]  }
 0x3df   : > { %1473 = vst.msk [vmem:[#allocation2 + $0xc8] sm:$0xff] %vm3284_vm1, %v1465_v10  ;;  %1472 = vst.msk [vmem:[#allocation2 + $0xc0] sm:$0xff] %vm3284_vm1, %v1464_v11  ;;  %v1459_v13 = vpop.permute.xlu0 %1458  ;;  %v1433_v14 = vpop.permute.xlu1 %1432 }
 0x3e0   : > { %v1463_v17 = vrot.slane %v1459_v13, 4  ;;  %v1438_v18 = vrot.slane %v1433_v14, 4  ;;  %1823 = vmatpush1.bf16.msra.mxu0 %v2682_v16  ;;  %v2904_v16 = vld [vmem:[%s3753_s3 + $0x4c] ss:$12 sps:$4 sm:$0xff]  }
 0x3e1   : > { %1824 = vmatprep.subr.bf16.mxu0 %v2867_v19 }
 0x3e2   : > { %v1467_v20 = vsel %vm369_vm5, %v1459_v13, %v1463_v17  ;;  %v1442_v21 = vsel %vm346_vm6, %v1433_v14, %v1438_v18  ;;  %v2870_v26 = vld [vmem:[#allocation2 + $0xf4] ss:$8 sps:$4 sm:$0xff]   ;;  %v2872_v31 = vld [vmem:[#allocation2 + $0xf0] ss:$8 sps:$4 sm:$0xff]  }
 0x3e3   : > { %1475 = vst.msk [vmem:[#allocation2 + $0xd8] sm:$0xff] %vm3284_vm1, %v1467_v20  ;;  %1450 = vst.msk [vmem:[#allocation2 + $0xb0] sm:$0xff] %vm3284_vm1, %v1442_v21  ;;  %v1431_v22 = vpop.permute.xlu0 %1430  ;;  %v1429_v23 = vpop.permute.xlu1 %1428  ;;  %v2900_v13 = vld [vmem:[%s3753_s3 + $0x30] ss:$12 sps:$4 sm:$0xff]   ;;  %v2903_v14 = vld [vmem:[%s3753_s3 + $0x38] ss:$12 sps:$4 sm:$0xff]  }
 0x3e4   : > { %v1437_v0 = vrot.slane %v1431_v22, 4  ;;  %v1436_v25 = vrot.slane %v1429_v23, 4  ;;  %1825 = vmatpush1.bf16.msra.mxu0 %v2869_v24  ;;  %v2906_v17 = vld [vmem:[%s3753_s3 + $0x48] ss:$12 sps:$4 sm:$0xff]   ;;  %v2907_v18 = vld [vmem:[%s3753_s3 + $0x50] ss:$12 sps:$4 sm:$0xff]  }
 0x3e5   : > { %1826 = vmatprep.subr.bf16.mxu0 %v2870_v26 }
 0x3e6   : > { %v1441_v27 = vsel %vm346_vm6, %v1431_v22, %v1437_v0  ;;  %v1440_v28 = vsel %vm346_vm6, %v1429_v23, %v1436_v25  ;;  %v2879_v50 = vld [vmem:[#allocation2 + $0xc4] ss:$8 sps:$4 sm:$0xff]   ;;  %v2881_v55 = vld [vmem:[#allocation2 + $0xc0] ss:$8 sps:$4 sm:$0xff]  }
 0x3e7   : > { %1449 = vst.msk [vmem:[#allocation2 + $0xa8] sm:$0xff] %vm3284_vm1, %v1441_v27  ;;  %1448 = vst.msk [vmem:[#allocation2 + $0xa0] sm:$0xff] %vm3284_vm1, %v1440_v28  ;;  %v1435_v29 = vpop.permute.xlu0 %1434  ;;  %v1409_v30 = vpop.permute.xlu1 %1408 }
 0x3e8   : > { %v1439_v32 = vrot.slane %v1435_v29, 4  ;;  %v1414_v34 = vrot.slane %v1409_v30, 4  ;;  %1827 = vmatpush2.bf16.msra.mxu0 %v2872_v31 }
 0x3e9   : > { %1828 = vmatprep.subr.bf16.mxu0 %v2873_v35 }
 0x3ea   : > { %v1443_v36 = vsel %vm346_vm6, %v1435_v29, %v1439_v32  ;;  %v1418_v37 = vsel %vm333_vm7, %v1409_v30, %v1414_v34  ;;  %v2876_v15 = vld [vmem:[#allocation2 + $0xd4] ss:$8 sps:$4 sm:$0xff]   ;;  %v2878_v47 = vld [vmem:[#allocation2 + $0xd0] ss:$8 sps:$4 sm:$0xff]  }
 0x3eb   : > { %1451 = vst.msk [vmem:[#allocation2 + $0xb8] sm:$0xff] %vm3284_vm1, %v1443_v36  ;;  %1426 = vst.msk [vmem:[#allocation2 + $0x90] sm:$0xff] %vm3284_vm1, %v1418_v37  ;;  %v1407_v38 = vpop.permute.xlu0 %1406  ;;  %v1505_v39 = vpop.permute.xlu1 %1504 }
 0x3ec   : > { %v1413_v41 = vrot.slane %v1407_v38, 4  ;;  %v1510_v42 = vrot.slane %v1505_v39, 4  ;;  %1829 = vmatpush2.bf16.msra.mxu0 %v2875_v40 }
 0x3ed   : > { %1830 = vmatprep.subr.bf16.mxu0 %v2876_v15 }
 0x3ee   : > { %v1417_v43 = vsel %vm333_vm7, %v1407_v38, %v1413_v41  ;;  %v1514_v44 = vsel %vm411_vm11, %v1505_v39, %v1510_v42  ;;  %v2885_v1 = vld [vmem:[#allocation2 + $0xa4] ss:$8 sps:$4 sm:$0xff]   ;;  %v2887_v3 = vld [vmem:[#allocation2 + $0xa0] ss:$8 sps:$4 sm:$0xff]  }
 0x3ef   : > { %1425 = vst.msk [vmem:[#allocation2 + $0x88] sm:$0xff] %vm3284_vm1, %v1417_v43  ;;  %1522 = vst.msk [vmem:[#allocation2 + $0x110] sm:$0xff] %vm3284_vm1, %v1514_v44  ;;  %v1411_v45 = vpop.permute.xlu0 %1410  ;;  %v1405_v46 = vpop.permute.xlu1 %1404 }
 0x3f0   : > { %v1415_v48 = vrot.slane %v1411_v45, 4  ;;  %v1412_v49 = vrot.slane %v1405_v46, 4  ;;  %1831 = vmatpush2.bf16.msra.mxu0 %v2878_v47 }
 0x3f1   : > { %1832 = vmatprep.subr.bf16.mxu0 %v2879_v50 }
 0x3f2   : > { %v1419_v51 = vsel %vm333_vm7, %v1411_v45, %v1415_v48  ;;  %v1416_v52 = vsel %vm333_vm7, %v1405_v46, %v1412_v49  ;;  %v2882_v58 = vld [vmem:[#allocation2 + $0xb4] ss:$8 sps:$4 sm:$0xff]   ;;  %v2884_v62 = vld [vmem:[#allocation2 + $0xb0] ss:$8 sps:$4 sm:$0xff]  }
 0x3f3   : > { %1427 = vst.msk [vmem:[#allocation2 + $0x98] sm:$0xff] %vm3284_vm1, %v1419_v51  ;;  %1424 = vst.msk [vmem:[#allocation2 + $0x80] sm:$0xff] %vm3284_vm1, %v1416_v52  ;;  %v1507_v53 = vpop.permute.xlu0 %1506  ;;  %v1501_v54 = vpop.permute.xlu1 %1500 }
 0x3f4   : > { %v1511_v56 = vrot.slane %v1507_v53, 4  ;;  %v1508_v57 = vrot.slane %v1501_v54, 4  ;;  %1833 = vmatpush2.bf16.msra.mxu0 %v2881_v55 }
 0x3f5   : > { %1834 = vmatprep.subr.bf16.mxu0 %v2882_v58 }
 0x3f6   : > { %v1515_v59 = vsel %vm411_vm11, %v1507_v53, %v1511_v56  ;;  %v1512_v60 = vsel %vm411_vm11, %v1501_v54, %v1508_v57 }
 0x3f7   : > { %1523 = vst.msk [vmem:[#allocation2 + $0x118] sm:$0xff] %vm3284_vm1, %v1515_v59  ;;  %1520 = vst.msk [vmem:[#allocation2 + $0x100] sm:$0xff] %vm3284_vm1, %v1512_v60  ;;  %v1503_v61 = vpop.permute.xlu0 %1502 }
 0x3f8   : > { %v1509_v63 = vrot.slane %v1503_v61, 4  ;;  %1835 = vmatpush2.bf16.msra.mxu0 %v2884_v62 }
 0x3f9   : > { %1836 = vmatprep.subr.bf16.mxu0 %v2885_v1 }
 0x3fa   : > { %v1513_v2 = vsel %vm411_vm11, %v1503_v61, %v1509_v63  ;;  %v2888_v4 = vld [vmem:[#allocation2 + $0x94] ss:$8 sps:$4 sm:$0xff]   ;;  %v2892_v7 = vld [vmem:[#allocation2 + $0x90] ss:$8 sps:$4 sm:$0xff]   ;;  %v2894_v9 = vld [vmem:[#allocation2 + $0x84] ss:$8 sps:$4 sm:$0xff]  }
 0x3fb   : > { %1521 = vst.msk [vmem:[#allocation2 + $0x108] sm:$0xff] %vm3284_vm1, %v1513_v2  ;;  %v2898_v12 = vld [vmem:[#allocation2 + $0x80] ss:$8 sps:$4 sm:$0xff]  }
 0x3fc   : > { %1837 = vmatpush2.bf16.msra.mxu0 %v2887_v3 }
 0x3fd   : > { %1838 = vmatprep.subr.bf16.mxu0 %v2888_v4 }
 0x3fe   : > { %v2890_v5 = vld [vmem:[#allocation2 + $0x114] ss:$8 sps:$4 sm:$0xff]   ;;  %v2893_v6 = vld [vmem:[#allocation2 + $0x110] ss:$8 sps:$4 sm:$0xff]  }
 0x3ff   : > { %1875 = vmatprep.subr.bf16.mxu1 %v2890_v5 }
 0x400   : > { %1839 = vmatpush2.bf16.msra.mxu0 %v2892_v7  ;;  %1876 = vmatpush1.bf16.msra.mxu1 %v2893_v6  ;;  %v1577_v19 = vpop.permute.xlu1 %1576 }
 0x401   : > { %1840 = vmatprep.subr.bf16.mxu0 %v2894_v9 }
 0x402   : > { %v2896_v10 = vld [vmem:[#allocation2 + $0x104] ss:$8 sps:$4 sm:$0xff]   ;;  %v2899_v11 = vld [vmem:[#allocation2 + $0x100] ss:$8 sps:$4 sm:$0xff]  }
 0x403   : > { %1877 = vmatprep.subr.bf16.mxu1 %v2896_v10 }
 0x404   : > { %1841 = vmatpush2.bf16.msra.mxu0 %v2898_v12  ;;  %1878 = vmatpush1.bf16.msra.mxu1 %v2899_v11  ;;  %v1582_v0 = vpop.permute.xlu0 %1581  ;;  %v1587_v34 = vpop.permute.xlu1 %1586 }
 0x407   : > { %1843 = vmatmul.mubr.bf16.vlgmr.msra.gmra.mxu0 %v2900_v13  ;;  %2716 = vmatmul.mubr.msk.bf16.vlgmr.msra.gmra.mxu1 %vm1161_vm14, %v2903_v14 }
 0x408   : > { %1852 = vmatprep.mubr.bf16.mxu0 %v2904_v16  ;;  %1905 = vmatprep.mubr.bf16.mxu1 %v2924_v8  ;;  %v1592_v46 = vpop.permute.xlu0 %1591  ;;  %v2255_v16 = vld [vmem:[%s3755_s5 + $0x98] sm:$0xff] }
 0x40f   : > { %1853 = vmatmul.mubr.bf16.gmra.mxu0 %v2906_v17  ;;  %2717 = vmatmul.mubr.msk.bf16.gmra.mxu1 %vm1161_vm14, %v2907_v18  ;;  %v2257_v17 = vld [vmem:[%s3755_s5 + $0xa8] sm:$0xff]  ;;  %v2259_v18 = vld [vmem:[%s3755_s5 + $0xb8] sm:$0xff] }
 0x4c7   : > { %v1844_v20 = vpop.f32.mrf.mxu0  ;;  %v1897_v21 = vpop.f32.mrf.mxu1 }
 0x4c8   : > { %v1845_v22 = vadd.f32 %v1844_v20, %v1577_v19  ;;  %v2256_v20 = vld [vmem:[%s3755_s5 + $0xa0] sm:$0xff] }
 0x4c9   : > { %v1846_v23 = vpop.f32.mrf.mxu0  ;;  %v1899_v24 = vpop.f32.mrf.mxu1 }
 0x4ca   : > { %v1847_v25 = vadd.f32 %v1846_v23, %v1577_v19  ;;  %v1898_v8 = vadd.f32 %v1897_v21, %v1845_v22  ;;  %v2261_v19 = vld [vmem:[%s3755_s5 + $0xc8] sm:$0xff]  ;;  %v3568_v21 = vpop.permute.xlu1 %2274  ;;  %v2258_v22 = vld [vmem:[%s3755_s5 + $0xb0] sm:$0xff]  ;;  %v3573_v23 = vpop.permute.xlu0 %2279 }
 0x4cb   : > { %v1848_v26 = vpop.f32.mrf.mxu0  ;;  %v1901_v27 = vpop.f32.mrf.mxu1 }
 0x4cc   : > { %v1916_v28 = vmul.f32 0.2, %v1898_v8  ;;  %v1849_v29 = vadd.f32 %v1848_v26, %v1582_v0  ;;  %v1900_v30 = vadd.f32 %v1899_v24, %v1847_v25  ;;  %v2260_v25 = vld [vmem:[%s3755_s5 + $0xc0] sm:$0xff]  ;;  %v2262_v26 = vld [vmem:[%s3755_s5 + $0xd0] sm:$0xff] }
 0x4cd   : > { %v1850_v31 = vpop.f32.mrf.mxu0  ;;  %v1903_v32 = vpop.f32.mrf.mxu1 }
 0x4ce   : > { %v1917_v35 = vmul.f32 0.2, %v1900_v30  ;;  %v1851_v36 = vadd.f32 %v1850_v31, %v1582_v0  ;;  %v1902_v37 = vadd.f32 %v1901_v27, %v1849_v29  ;;  %v1924_v38 = vmax.f32 %v1898_v8, %v1916_v28  ;;  %v3575_v24 = vpop.permute.xlu1 %2284  ;;  %v2263_v0 = vld [vmem:[%s3755_s5 + $0xd8] sm:$0xff]  ;;  %v3584_v8 = vpop.permute.xlu0 %2289  ;;  %v2265_v28 = vld [vmem:[%s3755_s5 + $0xe8] sm:$0xff]  ;;  %v2264_v29 = vld [vmem:[%s3755_s5 + $0xe0] sm:$0xff] }
 0x4cf   : > { %v1854_v39 = vpop.f32.mrf.mxu0  ;;  %v1907_v40 = vpop.f32.mrf.mxu1 }
 0x4d0   : > { %v1925_v41 = vmax.f32 %v1900_v30, %v1917_v35  ;;  %v1918_v42 = vmul.f32 0.2, %v1902_v37  ;;  %v1855_v15 = vadd.f32 %v1854_v39, %v1587_v34  ;;  %v1904_v43 = vadd.f32 %v1903_v32, %v1851_v36  ;;  %v2267_v36 = vld [vmem:[%s3755_s5 + $0xf8] sm:$0xff] }
 0x4d1   : > { %v1856_v44 = vpop.f32.mrf.mxu0  ;;  %v1909_v45 = vpop.f32.mrf.mxu1 }
 0x4d2   : > { %v2732_v47 = vpack.c.bf16 %v1925_v41, %v1924_v38  ;;  %v1919_v48 = vmul.f32 0.2, %v1904_v43  ;;  %v1857_v49 = vadd.f32 %v1856_v44, %v1587_v34  ;;  %v1908_v50 = vadd.f32 %v1907_v40, %v1855_v15  ;;  %v3589_v27 = vpop.permute.xlu1 %2294  ;;  %v3598_v30 = vpop.permute.xlu0 %2299  ;;  %v2266_v34 = vld [vmem:[%s3755_s5 + $0xf0] sm:$0xff]  ;;  %v2269_v40 = vld [vmem:[%s3755_s5 + $0x108] sm:$0xff]  ;;  %v2271_v15 = vld [vmem:[%s3755_s5 + $0x118] sm:$0xff] }
 0x4d3   : > { %v1858_v51 = vpop.f32.mrf.mxu0  ;;  %v1911_v52 = vpop.f32.mrf.mxu1  ;;  %v1926_v53 = vmax.f32 %v1902_v37, %v1918_v42  ;;  %v2268_v37 = vld [vmem:[%s3755_s5 + $0x100] sm:$0xff]  ;;  %v2270_v41 = vld [vmem:[%s3755_s5 + $0x110] sm:$0xff] }
 0x4d4   : > { %1956 = vst.msk [vmem:[#allocation5] sm:$0xff] %vm3284_vm1, %v2732_v47  ;;  %v1927_v54 = vmax.f32 %v1904_v43, %v1919_v48  ;;  %v1859_v55 = vadd.f32 %v1858_v51, %v1592_v46  ;;  %v1910_v56 = vadd.f32 %v1909_v45, %v1857_v49  ;;  %v1920_v57 = vmul.f32 0.2, %v1908_v50 }
 0x4d5   : > { %v1860_v58 = vpop.f32.mrf.mxu0  ;;  %v1913_v59 = vpop.f32.mrf.mxu1 }
 0x4d6   : > { %v2733_v60 = vpack.c.bf16 %v1927_v54, %v1926_v53  ;;  %v1921_v61 = vmul.f32 0.2, %v1910_v56  ;;  %v1861_v62 = vadd.f32 %v1860_v58, %v1592_v46  ;;  %v1912_v63 = vadd.f32 %v1911_v52, %v1859_v55  ;;  %v3600_v31 = vpop.permute.xlu1 %2304  ;;  %v3602_v32 = vpop.permute.xlu0 %2309 }
 0x4d7   : > { %v1928_v1 = vmax.f32 %v1908_v50, %v1920_v57 }
 0x4d8   : > { %1957 = vst.msk [vmem:[#allocation5 + $0x8] sm:$0xff] %vm3284_vm1, %v2733_v60  ;;  %v1929_v2 = vmax.f32 %v1910_v56, %v1921_v61  ;;  %v1922_v3 = vmul.f32 0.2, %v1912_v63  ;;  %v1914_v4 = vadd.f32 %v1913_v59, %v1861_v62 }
 0x4da   : > { %v2734_v5 = vpack.c.bf16 %v1929_v2, %v1928_v1  ;;  %v1923_v6 = vmul.f32 0.2, %v1914_v4  ;;  %v1930_v9 = vmax.f32 %v1912_v63, %v1922_v3  ;;  %v3609_v35 = vpop.permute.xlu1 %2314  ;;  %v3618_v38 = vpop.permute.xlu0 %2319 }
 0x4db   : > { %v1960_v7 = vld [vmem:[#allocation5] sm:$0xff] }
 0x4dc   : > { %1958 = vst.msk [vmem:[#allocation5 + $0x10] sm:$0xff] %vm3284_vm1, %v2734_v5  ;;  %v1931_v10 = vmax.f32 %v1914_v4, %v1923_v6  ;;  %1972 = vrot.lane.b32.xlu1 %v1960_v7, %s2922_s14  ;;  %1964 = vst [vmem:[#allocation2] sm:$0xf] %v1960_v7 }
 0x4de   : > { %v2735_v11 = vpack.c.bf16 %v1931_v10, %v1930_v9  ;;  %v3620_v39 = vpop.permute.xlu1 %2324  ;;  %v3628_v42 = vpop.permute.xlu0 %2329 }
 0x4df   : > { %v1961_v12 = vld [vmem:[#allocation5 + $0x8] sm:$0xff] }
 0x4e0   : > { %1959 = vst.msk [vmem:[#allocation5 + $0x18] sm:$0xff] %vm3284_vm1, %v2735_v11  ;;  %1974 = vrot.lane.b32.xlu0 %v1961_v12, %s2922_s14  ;;  %1965 = vst [vmem:[#allocation2 + $0x8] sm:$0xf] %v1961_v12  ;;  %1996 = vrot.lane.b32.xlu1 %v1960_v7, %s2921_s13 }
 0x4e2   : > { %v3633_v43 = vpop.permute.xlu1 %2334  ;;  %v3635_v44 = vpop.permute.xlu0 %2339 }
 0x4e3   : > { %v1962_v13 = vld [vmem:[#allocation5 + $0x10] sm:$0xff] }
 0x4e4   : > { %1998 = vrot.lane.b32.xlu0 %v1961_v12, %s2921_s13  ;;  %2020 = vrot.lane.b32.xlu1 %v1960_v7, %s2920_s12  ;;  %1966 = vst [vmem:[#allocation2 + $0x10] sm:$0xf] %v1962_v13 }
 0x4e6   : > { %v3637_v45 = vpop.permute.xlu1 %2344  ;;  %v3639_v46 = vpop.permute.xlu0 %2349 }
 0x4e7   : > { %v1963_v14 = vld [vmem:[#allocation5 + $0x18] sm:$0xff] }
 0x4e8   : > { %2022 = vrot.lane.b32.xlu0 %v1961_v12, %s2920_s12  ;;  %2044 = vrot.lane.b32.xlu1 %v1960_v7, %s2919_s11  ;;  %1967 = vst [vmem:[#allocation2 + $0x18] sm:$0xf] %v1963_v14 }
 0x4ea   : > { %v3641_v47 = vpop.permute.xlu1 %2354  ;;  %v3643_v48 = vpop.permute.xlu0 %2359 }
 0x4ec   : > { %2046 = vrot.lane.b32.xlu0 %v1961_v12, %s2919_s11  ;;  %2068 = vrot.lane.b32.xlu1 %v1960_v7, %s2918_s10 }
 0x4f0   : > { %2070 = vrot.lane.b32.xlu0 %v1961_v12, %s2918_s10  ;;  %2092 = vrot.lane.b32.xlu1 %v1960_v7, %s2917_s9 }
 0x4f4   : > { %2094 = vrot.lane.b32.xlu0 %v1961_v12, %s2917_s9  ;;  %2116 = vrot.lane.b32.xlu1 %v1960_v7, %s2916_s8 }
 0x4f8   : > { %2118 = vrot.lane.b32.xlu0 %v1961_v12, %s2916_s8  ;;  %2140 = vrot.lane.b32.xlu1 %v1960_v7, %s2923_s15 }
 0x4fc   : > { %2142 = vrot.lane.b32.xlu0 %v1961_v12, %s2923_s15  ;;  %1976 = vrot.lane.b32.xlu1 %v1962_v13, %s2922_s14 }
 0x500   : > { %1978 = vrot.lane.b32.xlu0 %v1963_v14, %s2922_s14  ;;  %2364 = vperm.xlu1 %2755, %v2254_v33  }
 0x504   : > { %2369 = vperm.xlu0 %2754, %v2255_v16   ;;  %2000 = vrot.lane.b32.xlu1 %v1962_v13, %s2921_s13 }
 0x508   : > { %2002 = vrot.lane.b32.xlu0 %v1963_v14, %s2921_s13  ;;  %2024 = vrot.lane.b32.xlu1 %v1962_v13, %s2920_s12 }
 0x50c   : > { %2379 = vperm.xlu0 %2754, %v2257_v17   ;;  %2048 = vrot.lane.b32.xlu1 %v1962_v13, %s2919_s11 }
 0x510   : > { %2026 = vrot.lane.b32.xlu0 %v1963_v14, %s2920_s12  ;;  %2072 = vrot.lane.b32.xlu1 %v1962_v13, %s2918_s10 }
 0x514   : > { %2389 = vperm.xlu0 %2754, %v2259_v18   ;;  %2096 = vrot.lane.b32.xlu1 %v1962_v13, %s2917_s9 }
 0x518   : > { %2050 = vrot.lane.b32.xlu0 %v1963_v14, %s2919_s11  ;;  %2120 = vrot.lane.b32.xlu1 %v1962_v13, %s2916_s8  ;;  %s2529_s11 = sld [smem:[#allocation6]] }
 0x51c   : > { %2399 = vperm.xlu0 %2754, %v2261_v19   ;;  %2374 = vperm.xlu1 %2755, %v2256_v20  }
 0x520   : > { %2074 = vrot.lane.b32.xlu0 %v1963_v14, %s2918_s10  ;;  %2384 = vperm.xlu1 %2755, %v2258_v22  }
 0x524   : > { %2409 = vperm.xlu0 %2754, %v2263_v0   ;;  %2394 = vperm.xlu1 %2755, %v2260_v25  }
 0x528   : > { %2098 = vrot.lane.b32.xlu0 %v1963_v14, %s2917_s9  ;;  %2404 = vperm.xlu1 %2755, %v2262_v26  }
 0x52c   : > { %2419 = vperm.xlu0 %2754, %v2265_v28   ;;  %2414 = vperm.xlu1 %2755, %v2264_v29  }
 0x530   : > { %2122 = vrot.lane.b32.xlu0 %v1963_v14, %s2916_s8  ;;  %2144 = vrot.lane.b32.xlu1 %v1962_v13, %s2923_s15 }
 0x534   : > { %2424 = vperm.xlu0 %2754, %v2266_v34   ;;  %2146 = vrot.lane.b32.xlu1 %v1963_v14, %s2923_s15 }
 0x538   : > { %2429 = vperm.xlu0 %2754, %v2267_v36   ;;  %2434 = vperm.xlu1 %2755, %v2268_v37  }
 0x53c   : > { %2439 = vperm.xlu0 %2754, %v2269_v40   ;;  %2444 = vperm.xlu1 %2755, %v2270_v41  }
 0x540   : > { %2449 = vperm.xlu0 %2754, %v2271_v15  }
 0x54e   : > { %v1973_v49 = vpop.permute.xlu1 %1972 }
 0x54f   : > { %v1980_v50 = vrot.slane %v1973_v49, 4 }
 0x551   : > { %v1984_v51 = vsel %vm294_vm10, %v1973_v49, %v1980_v50 }
 0x552   : > { %1992 = vst [vmem:[#allocation2 + $0x20] sm:$0xf] %v1984_v51  ;;  %v1975_v52 = vpop.permute.xlu0 %1974  ;;  %v1997_v53 = vpop.permute.xlu1 %1996 }
 0x553   : > { %v1981_v54 = vrot.slane %v1975_v52, 4  ;;  %v2004_v55 = vrot.slane %v1997_v53, 4 }
 0x555   : > { %v1985_v56 = vsel %vm294_vm10, %v1975_v52, %v1981_v54  ;;  %v2008_v57 = vsel %vm307_vm9, %v1997_v53, %v2004_v55 }
 0x556   : > { %1993 = vst [vmem:[#allocation2 + $0x28] sm:$0xf] %v1985_v56  ;;  %2016 = vst [vmem:[#allocation2 + $0x40] sm:$0xf] %v2008_v57  ;;  %v1999_v58 = vpop.permute.xlu0 %1998  ;;  %v2021_v59 = vpop.permute.xlu1 %2020 }
 0x557   : > { %v2005_v60 = vrot.slane %v1999_v58, 4  ;;  %v2028_v61 = vrot.slane %v2021_v59, 4 }
 0x559   : > { %v2009_v62 = vsel %vm307_vm9, %v1999_v58, %v2005_v60  ;;  %v2032_v63 = vsel %vm320_vm8, %v2021_v59, %v2028_v61 }
 0x55a   : > { %2017 = vst [vmem:[#allocation2 + $0x48] sm:$0xf] %v2009_v62  ;;  %2040 = vst [vmem:[#allocation2 + $0x60] sm:$0xf] %v2032_v63  ;;  %v2023_v1 = vpop.permute.xlu0 %2022  ;;  %v2045_v2 = vpop.permute.xlu1 %2044 }
 0x55b   : > { %v2029_v3 = vrot.slane %v2023_v1, 4  ;;  %v2052_v4 = vrot.slane %v2045_v2, 4 }
 0x55d   : > { %v2033_v5 = vsel %vm320_vm8, %v2023_v1, %v2029_v3  ;;  %v2056_v6 = vsel %vm333_vm7, %v2045_v2, %v2052_v4 }
 0x55e   : > { %2041 = vst [vmem:[#allocation2 + $0x68] sm:$0xf] %v2033_v5  ;;  %2064 = vst [vmem:[#allocation2 + $0x80] sm:$0xf] %v2056_v6  ;;  %v2047_v7 = vpop.permute.xlu0 %2046  ;;  %v2069_v9 = vpop.permute.xlu1 %2068 }
 0x55f   : > { %v2053_v10 = vrot.slane %v2047_v7, 4  ;;  %v2076_v11 = vrot.slane %v2069_v9, 4 }
 0x561   : > { %v2057_v12 = vsel %vm333_vm7, %v2047_v7, %v2053_v10  ;;  %v2080_v13 = vsel %vm346_vm6, %v2069_v9, %v2076_v11 }
 0x562   : > { %2065 = vst [vmem:[#allocation2 + $0x88] sm:$0xf] %v2057_v12  ;;  %2088 = vst [vmem:[#allocation2 + $0xa0] sm:$0xf] %v2080_v13  ;;  %v2071_v14 = vpop.permute.xlu0 %2070  ;;  %v2093_v33 = vpop.permute.xlu1 %2092 }
 0x563   : > { %v2077_v16 = vrot.slane %v2071_v14, 4  ;;  %v2100_v17 = vrot.slane %v2093_v33, 4 }
 0x565   : > { %v2081_v18 = vsel %vm346_vm6, %v2071_v14, %v2077_v16  ;;  %v2104_v19 = vsel %vm369_vm5, %v2093_v33, %v2100_v17 }
 0x566   : > { %2089 = vst [vmem:[#allocation2 + $0xa8] sm:$0xf] %v2081_v18  ;;  %2112 = vst [vmem:[#allocation2 + $0xc0] sm:$0xf] %v2104_v19  ;;  %v2095_v20 = vpop.permute.xlu0 %2094  ;;  %v2117_v22 = vpop.permute.xlu1 %2116 }
 0x567   : > { %v2101_v0 = vrot.slane %v2095_v20, 4  ;;  %v2124_v25 = vrot.slane %v2117_v22, 4 }
 0x569   : > { %v2105_v26 = vsel %vm369_vm5, %v2095_v20, %v2101_v0  ;;  %v2128_v28 = vsel %vm390_vm4, %v2117_v22, %v2124_v25 }
 0x56a   : > { %2113 = vst [vmem:[#allocation2 + $0xc8] sm:$0xf] %v2105_v26  ;;  %2136 = vst [vmem:[#allocation2 + $0xe0] sm:$0xf] %v2128_v28  ;;  %v2119_v29 = vpop.permute.xlu0 %2118  ;;  %v2141_v34 = vpop.permute.xlu1 %2140 }
 0x56b   : > { %v2125_v36 = vrot.slane %v2119_v29, 4  ;;  %v2148_v37 = vrot.slane %v2141_v34, 4 }
 0x56d   : > { %v2129_v40 = vsel %vm390_vm4, %v2119_v29, %v2125_v36  ;;  %v2152_v41 = vsel %vm411_vm11, %v2141_v34, %v2148_v37  ;;  %v3678_v25 = vld [vmem:[#allocation2 + $0x10] ss:$152 sps:$4 sm:$0xff]  }
 0x56e   : > { %2137 = vst [vmem:[#allocation2 + $0xe8] sm:$0xf] %v2129_v40  ;;  %2160 = vst [vmem:[#allocation2 + $0x100] sm:$0xf] %v2152_v41  ;;  %v2143_v15 = vpop.permute.xlu0 %2142  ;;  %v1977_v49 = vpop.permute.xlu1 %1976 }
 0x56f   : > { %v2149_v50 = vrot.slane %v2143_v15, 4  ;;  %v1982_v51 = vrot.slane %v1977_v49, 4 }
 0x571   : > { %v2153_v52 = vsel %vm411_vm11, %v2143_v15, %v2149_v50  ;;  %v1986_v53 = vsel %vm294_vm10, %v1977_v49, %v1982_v51  ;;  %v3682_v37 = vld [vmem:[#allocation2 + $0x18] ss:$176 sps:$4 sm:$0xff]   ;;  %v2202_v15 = vunpack.c.l.bf16 %v3678_v25  ;;  %v2168_v51 = vld [vmem:[#allocation2 + $0x20] sm:$0xf] }
 0x572   : > { %2161 = vst [vmem:[#allocation2 + $0x108] sm:$0xf] %v2153_v52  ;;  %1994 = vst [vmem:[#allocation2 + $0x30] sm:$0xf] %v1986_v53  ;;  %v1979_v54 = vpop.permute.xlu0 %1978  ;;  %v2203_v52 = vunpack.c.l.bf16 %v3682_v37 }
 0x573   : > { %v1983_v55 = vrot.slane %v1979_v54, 4 }
 0x575   : > { %v1987_v56 = vsel %vm294_vm10, %v1979_v54, %v1983_v55  ;;  %v2169_v55 = vld [vmem:[#allocation2 + $0x28] sm:$0xf] }
 0x576   : > { %1995 = vst [vmem:[#allocation2 + $0x38] sm:$0xf] %v1987_v56  ;;  %v2204_v56 = vunpack.c.l.bf16 %v2168_v51 }
 0x579   : > { %v2165_v20 = vld [vmem:[#allocation2 + $0x8] ss:$40 sps:$4 sm:$0xff]  }
 0x57a   : > { %v2201_v29 = vunpack.c.l.bf16 %v2165_v20 }
 0x57b   : > { %v3663_v57 = vpop.permute.xlu1 %2364 }
 0x57c   : > { %v2453_v53 = vmul.f32 %v3573_v23, %v2201_v29  ;;  %v2456_v23 = vmul.f32 %v3589_v27, %v2204_v56 }
 0x57f   : > { %v3665_v58 = vpop.permute.xlu0 %2369  ;;  %v2001_v59 = vpop.permute.xlu1 %2000 }
 0x580   : > { %v2006_v60 = vrot.slane %v2001_v59, 4 }
 0x582   : > { %v2010_v61 = vsel %vm307_vm9, %v2001_v59, %v2006_v60  ;;  %v2454_v59 = vmul.f32 %v3575_v24, %v2202_v15 }
 0x583   : > { %2018 = vst [vmem:[#allocation2 + $0x50] sm:$0xf] %v2010_v61  ;;  %v2003_v62 = vpop.permute.xlu0 %2002  ;;  %v2025_v63 = vpop.permute.xlu1 %2024 }
 0x584   : > { %v2007_v1 = vrot.slane %v2003_v62, 4  ;;  %v2030_v2 = vrot.slane %v2025_v63, 4 }
 0x586   : > { %v2011_v3 = vsel %vm307_vm9, %v2003_v62, %v2007_v1  ;;  %v2034_v4 = vsel %vm320_vm8, %v2025_v63, %v2030_v2  ;;  %v2205_v1 = vunpack.c.l.bf16 %v2169_v55  ;;  %v2455_v2 = vmul.f32 %v3584_v8, %v2203_v52 }
 0x587   : > { %2019 = vst [vmem:[#allocation2 + $0x58] sm:$0xf] %v2011_v3  ;;  %2042 = vst [vmem:[#allocation2 + $0x70] sm:$0xf] %v2034_v4  ;;  %v3670_v5 = vpop.permute.xlu0 %2379  ;;  %v2049_v6 = vpop.permute.xlu1 %2048  ;;  %v2171_v4 = vld [vmem:[#allocation2 + $0x38] ss:$8 sps:$4 sm:$0xff]  }
 0x588   : > { %v2054_v7 = vrot.slane %v2049_v6, 4 }
 0x58a   : > { %v2058_v9 = vsel %vm333_vm7, %v2049_v6, %v2054_v7  ;;  %v2206_v7 = vunpack.c.h.bf16 %v2165_v20 }
 0x58b   : > { %2066 = vst [vmem:[#allocation2 + $0x90] sm:$0xf] %v2058_v9  ;;  %v2027_v10 = vpop.permute.xlu0 %2026  ;;  %v2073_v11 = vpop.permute.xlu1 %2072 }
 0x58c   : > { %v2031_v12 = vrot.slane %v2027_v10, 4  ;;  %v2078_v13 = vrot.slane %v2073_v11, 4  ;;  %v2458_v8 = vmul.f32 %v3600_v31, %v2206_v7 }
 0x58e   : > { %v2035_v14 = vsel %vm320_vm8, %v2027_v10, %v2031_v12  ;;  %v2082_v33 = vsel %vm346_vm6, %v2073_v11, %v2078_v13  ;;  %v2207_v10 = vunpack.c.l.bf16 %v2171_v4  ;;  %v2457_v11 = vmul.f32 %v3598_v30, %v2205_v1  ;;  %v2173_v13 = vld [vmem:[#allocation2 + $0x48] ss:$8 sps:$4 sm:$0xff]  }
 0x58f   : > { %2043 = vst [vmem:[#allocation2 + $0x78] sm:$0xf] %v2035_v14  ;;  %2090 = vst [vmem:[#allocation2 + $0xb0] sm:$0xf] %v2082_v33  ;;  %v3675_v16 = vpop.permute.xlu0 %2389  ;;  %v2097_v17 = vpop.permute.xlu1 %2096  ;;  %v2208_v14 = vunpack.c.h.bf16 %v2171_v4  ;;  %v2209_v27 = vunpack.c.l.bf16 %v2173_v13  ;;  %v2177_v51 = vld [vmem:[#allocation2 + $0x68] ss:$8 sps:$4 sm:$0xff]  }
 0x590   : > { %v2102_v18 = vrot.slane %v2097_v17, 4  ;;  %v2459_v20 = vmul.f32 %v3602_v32, %v2207_v10 }
 0x591   : > { %v2460_v30 = vmul.f32 %v3609_v35, %v2208_v14  ;;  %v2461_v15 = vmul.f32 %v3618_v38, %v2209_v27  ;;  %v2213_v35 = vunpack.c.l.bf16 %v2177_v51  ;;  %v2214_v38 = vunpack.c.h.bf16 %v2177_v51 }
 0x592   : > { %v2106_v19 = vsel %vm369_vm5, %v2097_v17, %v2102_v18  ;;  %v2181_v10 = vld [vmem:[#allocation2 + $0x88] ss:$8 sps:$4 sm:$0xff]  }
 0x593   : > { %2114 = vst [vmem:[#allocation2 + $0xd0] sm:$0xf] %v2106_v19  ;;  %v2051_v22 = vpop.permute.xlu0 %2050  ;;  %v2121_v0 = vpop.permute.xlu1 %2120  ;;  %v2217_v14 = vunpack.c.l.bf16 %v2181_v10 }
 0x594   : > { %v2055_v26 = vrot.slane %v2051_v22, 4  ;;  %v2126_v28 = vrot.slane %v2121_v0, 4 }
 0x596   : > { %v2059_v34 = vsel %vm333_vm7, %v2051_v22, %v2055_v26  ;;  %v2130_v36 = vsel %vm390_vm4, %v2121_v0, %v2126_v28  ;;  %v3684_v40 = vld [vmem:[#allocation2] ss:$176 sps:$4 sm:$0xff]   ;;  %v2210_v28 = vunpack.c.h.bf16 %v2173_v13 }
 0x597   : > { %2067 = vst [vmem:[#allocation2 + $0x98] sm:$0xf] %v2059_v34  ;;  %2138 = vst [vmem:[#allocation2 + $0xf0] sm:$0xf] %v2130_v36  ;;  %v3686_v41 = vpop.permute.xlu0 %2399  ;;  %v3689_v49 = vpop.permute.xlu1 %2374  ;;  %v2200_v50 = vunpack.c.l.bf16 %v3684_v40  ;;  %v2175_v0 = vld [vmem:[#allocation2 + $0x58] ss:$8 sps:$4 sm:$0xff]   ;;  %v2222_v51 = vunpack.c.h.bf16 %v3684_v40 }
 0x598   : > { %v2211_v36 = vunpack.c.l.bf16 %v2175_v0  ;;  %v2212_v52 = vunpack.c.h.bf16 %v2175_v0  ;;  %v2462_v32 = vmul.f32 %v3620_v39, %v2210_v28 }
 0x599   : > { %v2452_v54 = vmul.f32 %v3568_v21, %v2200_v50 }
 0x59b   : > { %v2488_v60 = vadd.f32 %v2453_v53, %v2452_v54  ;;  %v2075_v61 = vpop.permute.xlu0 %2074  ;;  %v3696_v62 = vpop.permute.xlu1 %2384 }
 0x59c   : > { %v2079_v63 = vrot.slane %v2075_v61, 4 }
 0x59d   : > { %v2489_v3 = vadd.f32 %v2488_v60, %v2454_v59  ;;  %v2463_v60 = vmul.f32 %v3628_v42, %v2211_v36 }
 0x59e   : > { %v2083_v6 = vsel %vm346_vm6, %v2075_v61, %v2079_v63  ;;  %v2179_v63 = vld [vmem:[#allocation2 + $0x78] ss:$8 sps:$4 sm:$0xff]  }
 0x59f   : > { %v2490_v21 = vadd.f32 %v2489_v3, %v2455_v2  ;;  %2091 = vst [vmem:[#allocation2 + $0xb8] sm:$0xf] %v2083_v6  ;;  %v3701_v9 = vpop.permute.xlu0 %2409  ;;  %v3703_v24 = vpop.permute.xlu1 %2394  ;;  %v2464_v3 = vmul.f32 %v3633_v43, %v2212_v52  ;;  %v2215_v7 = vunpack.c.l.bf16 %v2179_v63  ;;  %v2474_v52 = vmul.f32 %v3696_v62, %v2222_v51 }
 0x5a1   : > { %v2491_v12 = vadd.f32 %v2490_v21, %v2456_v23  ;;  %v2465_v23 = vmul.f32 %v3635_v44, %v2213_v35  ;;  %v2467_v43 = vmul.f32 %v3639_v46, %v2215_v7  ;;  %v2469_v44 = vmul.f32 %v3643_v48, %v2217_v14  ;;  %v2196_v7 = vld [vmem:[#allocation2 + $0x100] ss:$8 sps:$4 sm:$0xff]  }
 0x5a2   : > { %v2221_v46 = vunpack.c.h.bf16 %v3678_v25  ;;  %v2225_v25 = vunpack.c.h.bf16 %v3682_v37 }
 0x5a3   : > { %v2492_v33 = vadd.f32 %v2491_v12, %v2457_v11  ;;  %v2099_v17 = vpop.permute.xlu0 %2098  ;;  %v3707_v18 = vpop.permute.xlu1 %2404  ;;  %v2216_v11 = vunpack.c.h.bf16 %v2179_v63  ;;  %v2466_v12 = vmul.f32 %v3637_v45, %v2214_v38 }
 0x5a4   : > { %v2103_v19 = vrot.slane %v2099_v17, 4 }
 0x5a5   : > { %v2493_v22 = vadd.f32 %v2492_v33, %v2458_v8  ;;  %v2183_v33 = vld [vmem:[#allocation2 + $0x98] ss:$8 sps:$4 sm:$0xff]  }
 0x5a6   : > { %v2107_v26 = vsel %vm369_vm5, %v2099_v17, %v2103_v19  ;;  %v2218_v17 = vunpack.c.h.bf16 %v2181_v10  ;;  %v2468_v19 = vmul.f32 %v3641_v47, %v2216_v11  ;;  %v2220_v0 = vunpack.c.h.bf16 %v2183_v33 }
 0x5a7   : > { %v2494_v29 = vadd.f32 %v2493_v22, %v2459_v20  ;;  %2115 = vst [vmem:[#allocation2 + $0xd8] sm:$0xf] %v2107_v26  ;;  %v3712_v34 = vpop.permute.xlu0 %2419  ;;  %v3714_v31 = vpop.permute.xlu1 %2414  ;;  %v2219_v20 = vunpack.c.l.bf16 %v2183_v33  ;;  %v2473_v47 = vmul.f32 %v3670_v5, %v2221_v46  ;;  %v2477_v5 = vmul.f32 %v3686_v41, %v2225_v25 }
 0x5a8   : > { %v2470_v26 = vmul.f32 %v3663_v57, %v2218_v17  ;;  %v2472_v36 = vmul.f32 %v3689_v49, %v2220_v0  ;;  %v2530_v46 = vstv %s2529_s11 }
 0x5a9   : > { %v2495_v50 = vadd.f32 %v2494_v29, %v2460_v30  ;;  %v2471_v45 = vmul.f32 %v3665_v58, %v2219_v20  ;;  %v2187_v29 = vld [vmem:[#allocation2 + $0xb8] ss:$8 sps:$4 sm:$0xff]  }
 0x5aa   : > { %v2223_v48 = vunpack.c.l.bf16 %v2187_v29  ;;  %v2224_v57 = vunpack.c.h.bf16 %v2187_v29 }
 0x5ab   : > { %v2496_v53 = vadd.f32 %v2495_v50, %v2461_v15  ;;  %v2123_v54 = vpop.permute.xlu0 %2122  ;;  %v2145_v55 = vpop.permute.xlu1 %2144 }
 0x5ac   : > { %v2127_v56 = vrot.slane %v2123_v54, 4  ;;  %v2150_v59 = vrot.slane %v2145_v55, 4  ;;  %v2475_v58 = vmul.f32 %v3675_v16, %v2223_v48  ;;  %v2476_v49 = vmul.f32 %v3703_v24, %v2224_v57 }
 0x5ad   : > { %v2497_v61 = vadd.f32 %v2496_v53, %v2462_v32 }
 0x5ae   : > { %v2131_v1 = vsel %vm390_vm4, %v2123_v54, %v2127_v56  ;;  %v2154_v2 = vsel %vm411_vm11, %v2145_v55, %v2150_v59  ;;  %v2190_v54 = vld [vmem:[#allocation2 + $0xd0] ss:$24 sps:$4 sm:$0xff]   ;;  %v2191_v55 = vld [vmem:[#allocation2 + $0xd8] ss:$8 sps:$4 sm:$0xff]  }
 0x5af   : > { %v2498_v4 = vadd.f32 %v2497_v61, %v2463_v60  ;;  %2139 = vst [vmem:[#allocation2 + $0xf8] sm:$0xf] %v2131_v1  ;;  %2162 = vst [vmem:[#allocation2 + $0x110] sm:$0xf] %v2154_v2  ;;  %v2147_v39 = vpop.permute.xlu1 %2146  ;;  %v2425_v59 = vpop.permute.xlu0 %2424  ;;  %v2226_v40 = vunpack.c.l.bf16 %v2190_v54  ;;  %v2227_v60 = vunpack.c.l.bf16 %v2191_v55  ;;  %v2228_v63 = vunpack.c.h.bf16 %v2191_v55 }
 0x5b0   : > { %v2151_v6 = vrot.slane %v2147_v39, 4 }
 0x5b1   : > { %v2499_v21 = vadd.f32 %v2498_v4, %v2464_v3  ;;  %v2478_v62 = vmul.f32 %v3707_v18, %v2226_v40  ;;  %v2479_v16 = vmul.f32 %v3701_v9, %v2227_v60  ;;  %v2229_v3 = vunpack.c.h.bf16 %v2190_v54 }
 0x5b2   : > { %v2155_v42 = vsel %vm411_vm11, %v2147_v39, %v2151_v6  ;;  %v2480_v37 = vmul.f32 %v3714_v31, %v2228_v63 }
 0x5b3   : > { %v2500_v13 = vadd.f32 %v2499_v21, %v2465_v23  ;;  %2163 = vst [vmem:[#allocation2 + $0x118] sm:$0xf] %v2155_v42  ;;  %v2430_v38 = vpop.permute.xlu0 %2429  ;;  %v2481_v39 = vmul.f32 %v3712_v34, %v2229_v3  ;;  %v2435_v18 = vpop.permute.xlu1 %2434 }
 0x5b5   : > { %v2501_v8 = vadd.f32 %v2500_v13, %v2466_v12  ;;  %v2232_v13 = vunpack.c.l.bf16 %v2196_v7 }
 0x5b6   : > { %v2194_v1 = vld [vmem:[#allocation2 + $0xf0] ss:$8 sps:$4 sm:$0xff]  }
 0x5b7   : > { %v2502_v27 = vadd.f32 %v2501_v8, %v2467_v43  ;;  %v2230_v4 = vunpack.c.l.bf16 %v2194_v1  ;;  %v2231_v6 = vunpack.c.h.bf16 %v2194_v1  ;;  %v2440_v10 = vpop.permute.xlu0 %2439  ;;  %v2484_v14 = vmul.f32 %v2435_v18, %v2232_v13  ;;  %v2445_v34 = vpop.permute.xlu1 %2444 }
 0x5b8   : > { %v2233_v43 = vunpack.c.h.bf16 %v2196_v7 }
 0x5b9   : > { %v2503_v22 = vadd.f32 %v2502_v27, %v2468_v19  ;;  %v2482_v23 = vmul.f32 %v2425_v59, %v2230_v4  ;;  %v2483_v12 = vmul.f32 %v2430_v38, %v2231_v6 }
 0x5ba   : > { %v2198_v42 = vld [vmem:[#allocation2 + $0x110] ss:$8 sps:$4 sm:$0xff]   ;;  %v2485_v33 = vmul.f32 %v2440_v10, %v2233_v43 }
 0x5bb   : > { %v2504_v28 = vadd.f32 %v2503_v22, %v2469_v44  ;;  %v2234_v8 = vunpack.c.l.bf16 %v2198_v42  ;;  %v2235_v17 = vunpack.c.h.bf16 %v2198_v42  ;;  %v2450_v19 = vpop.permute.xlu0 %2449 }
 0x5bd   : > { %v2505_v30 = vadd.f32 %v2504_v28, %v2470_v26  ;;  %v2486_v20 = vmul.f32 %v2445_v34, %v2234_v8  ;;  %v2487_v22 = vmul.f32 %v2450_v19, %v2235_v17 }
 0x5bf   : > { %v2506_v15 = vadd.f32 %v2505_v30, %v2471_v45 }
 0x5c1   : > { %v2507_v50 = vadd.f32 %v2506_v15, %v2472_v36 }
 0x5c3   : > { %v2508_v32 = vadd.f32 %v2507_v50, %v2473_v47 }
 0x5c5   : > { %v2509_v53 = vadd.f32 %v2508_v32, %v2474_v52 }
 0x5c7   : > { %v2510_v56 = vadd.f32 %v2509_v53, %v2475_v58 }
 0x5c9   : > { %v2511_v35 = vadd.f32 %v2510_v56, %v2476_v49 }
 0x5cb   : > { %v2512_v61 = vadd.f32 %v2511_v35, %v2477_v5 }
 0x5cd   : > { %v2513_v2 = vadd.f32 %v2512_v61, %v2478_v62 }
 0x5cf   : > { %v2514_v24 = vadd.f32 %v2513_v2, %v2479_v16 }
 0x5d1   : > { %v2515_v41 = vadd.f32 %v2514_v24, %v2480_v37 }
 0x5d3   : > { %v2516_v21 = vadd.f32 %v2515_v41, %v2481_v39 }
 0x5d5   : > { %v2517_v11 = vadd.f32 %v2516_v21, %v2482_v23 }
 0x5d7   : > { %v2518_v9 = vadd.f32 %v2517_v11, %v2483_v12 }
 0x5d9   : > { %v2519_v31 = vadd.f32 %v2518_v9, %v2484_v14 }
 0x5db   : > { %v2520_v27 = vadd.f32 %v2519_v31, %v2485_v33 }
 0x5dd   : > { %v2521_v44 = vadd.f32 %v2520_v27, %v2486_v20 }
 0x5df   : > { %v2522_v0 = vadd.f32 %v2521_v44, %v2487_v22 }
 0x5e1   : > { %v2523_v26 = vrot.slane %v2522_v0, 4 }
 0x5e3   : > { %v2524_v28 = vadd.f32 %v2523_v26, %v2522_v0 }
 0x5e5   : > { %v2525_v45 = vrot.slane %v2524_v28, 2 }
 0x5e7   : > { %v2526_v30 = vadd.f32 %v2525_v45, %v2524_v28 }
 0x5e9   : > { %v2527_v29 = vrot.slane %v2526_v30, 1 }
 0x5eb   : > { %v2528_v36 = vadd.f32 %v2527_v29, %v2526_v30 }
 0x5ed   : > { %v2531_v15 = vadd.f32 %v2530_v46, %v2528_v36 }
 0x5ef   : > { %2532 = vst [vmem:[%s275_s23] sm:$0x1] %v2531_v15 }
 0x5f0 PF: > { %s18_s26 = sadd.s32 1, %s2914_s26  }
 0x5f1   : > { %p15_p4 = scmp.ge.s32.totalorder %s18_s26, 4  }
 0x5f3   :  { %17 = sbr.rel (!%p15_p4) target bundleno = 2 (0x2), region = 80 }

</bundles_post_ra>
